<compile_context>
chip_gen: v7x
topology: tpu7x:2x2x1
jax: 0.10.0
libtpu: 0.0.40
codegen_flags: <defaults>
</compile_context>

<pallas_src>
import math
from functools import partial

import jax
import jax.numpy as jnp
from jax.experimental import pallas as pl
from jax.experimental.pallas import tpu as pltpu

# ----------------------------------------------------------------------------
# Activation codes (static kernel parameters)
# ----------------------------------------------------------------------------
ACT_ID, ACT_RELU, ACT_PRELU, ACT_RELU6 = 0, 1, 2, 3
PRELU_ALPHA = 0.25                         # nn.PReLU() default init
BN_SCALE = 1.0 / math.sqrt(1.0 + 1e-5)     # eval-mode BN with default params

# Per-generation knobs (review: gate tile cap / 2-TC split by chip).
try:
    _DEV_KIND = jax.devices()[0].device_kind.lower()
except Exception:                          # pragma: no cover
    _DEV_KIND = ""
_IS_V7 = ("v7" in _DEV_KIND) or ("7x" in _DEV_KIND)
_M_CAP = 512 if _IS_V7 else 1024           # v7x: 64 MiB VMEM -> moderate tiles


def _round_up(x, m):
    return ((x + m - 1) // m) * m


def _apply_act(y, act, alpha):
    if act == ACT_RELU:
        return jnp.maximum(y, 0.0)
    if act == ACT_PRELU:
        return jnp.where(y >= 0.0, y, alpha * y)
    if act == ACT_RELU6:
        return jnp.clip(y, 0.0, 6.0)
    return y


def _tile_m(M):
    """M tile: biggest tile <= cap, M padded up to a multiple of the tile."""
    Mp8 = _round_up(M, 8)
    tm = min(_M_CAP, Mp8)
    # v7x has 2 TensorCores: guarantee >=2 blocks on the parallel M axis.
    if _IS_V7 and tm == Mp8 and M >= 16:
        tm = _round_up(Mp8 // 2, 8)
    Mp = _round_up(Mp8, tm)
    return tm, Mp


# ----------------------------------------------------------------------------
# Pallas kernel 1: fused matmul
#   y = X @ W            (bf16 operands, f32 accumulation on the MXU; optional
#                         K-blocking with an f32 VMEM scratch accumulator)
#   y = y + bias         (true Linear bias only; BN is folded into W)
#   y = act(y)           (block activation)
#   y = act(y + res)     (optional residual add + out-activation)
# NOTE on the double activation: the reference module's ext_conv3 / ext_conv2
# Sequentials end with activation(), and out_activation() is applied again
# after main+ext -- so applying act before AND after the residual add matches
# the given PyTorch spec.
# ----------------------------------------------------------------------------
def _mm_kernel(*refs, act, alpha, has_bias, has_res, multi_k):
    pos = 0
    x_ref = refs[pos]; pos += 1
    w_ref = refs[pos]; pos += 1
    b_ref = None
    r_ref = None
    if has_bias:
        b_ref = refs[pos]; pos += 1
    if has_res:
        r_ref = refs[pos]; pos += 1
    o_ref = refs[pos]; pos += 1
    acc_ref = refs[pos] if multi_k else None

    def epilogue(y):
        if has_bias:
            y = y + b_ref[...]
        y = _apply_act(y, act, alpha)
        if has_res:
            y = _apply_act(y + r_ref[...].astype(jnp.float32), act, alpha)
        o_ref[...] = y.astype(o_ref.dtype)

    if multi_k:
        k = pl.program_id(2)

        @pl.when(k == 0)
        def _():
            acc_ref[...] = jnp.zeros_like(acc_ref)

        acc_ref[...] += jnp.dot(x_ref[...], w_ref[...],
                                preferred_element_type=jnp.float32)

        @pl.when(k == pl.num_programs(2) - 1)
        def _():
            epilogue(acc_ref[...])
    else:
        epilogue(jnp.dot(x_ref[...], w_ref[...],
                         preferred_element_type=jnp.float32))


@partial(jax.jit, static_argnames=("act", "alpha", "out_dtype"))
def matmul_fused(x, w, bias=None, residual=None,
                 act=ACT_ID, alpha=PRELU_ALPHA, out_dtype=jnp.bfloat16):
    M, K = x.shape
    N = w.shape[1]
    has_bias = bias is not None
    has_res = residual is not None

    # N: pad to a lane-dense multiple of 128 (unmasked stores), slice after.
    Np = _round_up(N, 128)
    tn = 256 if Np % 256 == 0 else 128
    # K: block large reductions (bounds VMEM on v7x, restores pipelining).
    if K > 1024:
        tk = 512
        Kp = _round_up(K, tk)
    else:
        tk, Kp = K, K
    multi_k = (Kp // tk) > 1
    # M: pad up to the tile, no tiny-tile fallback.
    tm, Mp = _tile_m(M)

    xb = jnp.pad(x.astype(jnp.bfloat16), ((0, Mp - M), (0, Kp - K)))
    wb = jnp.pad(w.astype(jnp.bfloat16), ((0, Kp - K), (0, Np - N)))

    in_specs = [pl.BlockSpec((tm, tk), lambda i, j, k: (i, k)),
                pl.BlockSpec((tk, tn), lambda i, j, k: (k, j))]
    args = [xb, wb]
    if has_bias:
        in_specs.append(pl.BlockSpec((1, tn), lambda i, j, k: (0, j)))
        args.append(jnp.pad(bias.astype(jnp.float32).reshape(1, N),
                            ((0, 0), (0, Np - N))))
    if has_res:
        in_specs.append(pl.BlockSpec((tm, tn), lambda i, j, k: (i, j)))
        args.append(jnp.pad(residual.astype(jnp.bfloat16),
                            ((0, Mp - M), (0, Np - N))))

    grid = (Mp // tm, Np // tn, Kp // tk)
    out_bytes = Mp * Np * jnp.dtype(out_dtype).itemsize
    bytes_acc = (2 * Mp * Kp * grid[1] + 2 * Kp * Np * grid[0]
                 + (2 * Mp * Np if has_res else 0)
                 + (4 * Np if has_bias else 0) + out_bytes)
    cost = pl.CostEstimate(flops=2 * Mp * Kp * Np, transcendentals=0,
                           bytes_accessed=int(bytes_acc))

    out = pl.pallas_call(
        partial(_mm_kernel, act=act, alpha=alpha, has_bias=has_bias,
                has_res=has_res, multi_k=multi_k),
        out_shape=jax.ShapeDtypeStruct((Mp, Np), out_dtype),
        grid=grid,
        in_specs=in_specs,
        out_specs=pl.BlockSpec((tm, tn), lambda i, j, k: (i, j)),
        scratch_shapes=([pltpu.VMEM((tm, tn), jnp.float32)] if multi_k else []),
        compiler_params=pltpu.CompilerParams(
            dimension_semantics=("parallel", "parallel", "arbitrary")),
        cost_estimate=cost,
    )(*args)
    return out[:M, :N]


# ----------------------------------------------------------------------------
# Pallas kernel 2: batched 1x1 expansion + residual + out-act + FiLM + ReLU6
#   (the stage-final bottleneck conv; FiLM gamma/beta are per batch element)
# ----------------------------------------------------------------------------
def _mm_film_kernel(x_ref, w_ref, r_ref, a_ref, b_ref, o_ref, *, act, alpha):
    y = jnp.dot(x_ref[0], w_ref[...], preferred_element_type=jnp.float32)
    y = _apply_act(y, act, alpha)                                 # ext_conv3 act
    y = _apply_act(y + r_ref[0].astype(jnp.float32), act, alpha)  # out_activation
    y = y * a_ref[0] + b_ref[0]                                   # (1-gamma)*x + beta
    o_ref[0] = jnp.clip(y, 0.0, 6.0).astype(o_ref.dtype)          # ReLU6


@partial(jax.jit, static_argnames=("act", "alpha"))
def matmul_film_fused(x, w, residual, film_a, film_b,
                      act=ACT_PRELU, alpha=PRELU_ALPHA):
    # x: (B, M, K); w: (K, N); residual: (B, M, N); film_a/b: (B, N)
    B, M, K = x.shape
    N = w.shape[1]
    tm, Mp = _tile_m(M)
    xb = jnp.pad(x.astype(jnp.bfloat16), ((0, 0), (0, Mp - M), (0, 0)))
    rb = jnp.pad(residual.astype(jnp.bfloat16), ((0, 0), (0, Mp - M), (0, 0)))
    wb = w.astype(jnp.bfloat16)
    a3 = film_a.astype(jnp.float32).reshape(B, 1, N)
    b3 = film_b.astype(jnp.float32).reshape(B, 1, N)

    cost = pl.CostEstimate(
        flops=2 * B * Mp * K * N, transcendentals=0,
        bytes_accessed=int(2 * (B * Mp * K + K * N + 2 * B * Mp * N) + 8 * B * N))

    out = pl.pallas_call(
        partial(_mm_film_kernel, act=act, alpha=alpha),
        out_shape=jax.ShapeDtypeStruct((B, Mp, N), jnp.bfloat16),
        grid=(B, Mp // tm),
        in_specs=[pl.BlockSpec((1, tm, K), lambda b, i: (b, i, 0)),
                  pl.BlockSpec((K, N), lambda b, i: (0, 0)),
                  pl.BlockSpec((1, tm, N), lambda b, i: (b, i, 0)),
                  pl.BlockSpec((1, 1, N), lambda b, i: (b, 0, 0)),
                  pl.BlockSpec((1, 1, N), lambda b, i: (b, 0, 0))],
        out_specs=pl.BlockSpec((1, tm, N), lambda b, i: (b, i, 0)),
        compiler_params=pltpu.CompilerParams(
            dimension_semantics=("parallel", "parallel")),
        cost_estimate=cost,
    )(xb, wb, rb, a3, b3)
    return out[:, :M]


# ----------------------------------------------------------------------------
# Pallas kernel 3: implicit-GEMM stride-1 conv (3x3 / dilated / 5x1 / 1x5)
#   One padded NHWC image per grid step; the kh*kw taps are a static in-kernel
#   loop of matmuls with f32 accumulation -> no im2col materialization in HBM.
#   BN is folded into the weights; the activation runs in the epilogue.
# ----------------------------------------------------------------------------
def _conv_s1_kernel(x_ref, w_ref, o_ref, *, kh, kw, dil, Ho, Wo, act, alpha):
    cout = o_ref.shape[-1]
    xv = x_ref[0]                                        # (Hp, Wp, C)
    acc = jnp.zeros((Ho * Wo, cout), jnp.float32)
    for i in range(kh):
        for j in range(kw):
            xs = xv[i * dil:i * dil + Ho, j * dil:j * dil + Wo, :]
            xs = xs.reshape(Ho * Wo, xs.shape[-1])
            acc = acc + jnp.dot(xs, w_ref[i * kw + j],
                                preferred_element_type=jnp.float32)
    y = _apply_act(acc, act, alpha)
    o_ref[0] = y.reshape(Ho, Wo, cout).astype(o_ref.dtype)


@partial(jax.jit, static_argnames=("kh", "kw", "pad_h", "pad_w", "dil",
                                   "act", "alpha"))
def conv_s1(x, w, kh, kw, pad_h, pad_w, dil, act=ACT_ID, alpha=PRELU_ALPHA):
    # x: (B, H, W, C) NHWC;  w: (kh*kw, C, Cout) with BN folded in.
    B, H, W_, C = x.shape
    cout = w.shape[-1]
    Ho = H + 2 * pad_h - dil * (kh - 1)
    Wo = W_ + 2 * pad_w - dil * (kw - 1)
    Wo_p = _round_up(Wo, 8)                 # keep the in-kernel reshape trivial
    extra_w = Wo_p - Wo
    xp = jnp.pad(x.astype(jnp.bfloat16),
                 ((0, 0), (pad_h, pad_h), (pad_w, pad_w + extra_w), (0, 0)))
    Hp, Wp = H + 2 * pad_h, W_ + 2 * pad_w + extra_w
    wb = w.astype(jnp.bfloat16)

    cost = pl.CostEstimate(
        flops=2 * B * Ho * Wo_p * kh * kw * C * cout, transcendentals=0,
        bytes_accessed=int(2 * (B * Hp * Wp * C + kh * kw * C * cout
                                + B * Ho * Wo_p * cout)))

    out = pl.pallas_call(
        partial(_conv_s1_kernel, kh=kh, kw=kw, dil=dil, Ho=Ho, Wo=Wo_p,
                act=act, alpha=alpha),
        out_shape=jax.ShapeDtypeStruct((B, Ho, Wo_p, cout), jnp.bfloat16),
        grid=(B,),
        in_specs=[pl.BlockSpec((1, Hp, Wp, C), lambda b: (b, 0, 0, 0)),
                  pl.BlockSpec((kh * kw, C, cout), lambda b: (0, 0, 0))],
        out_specs=pl.BlockSpec((1, Ho, Wo_p, cout), lambda b: (b, 0, 0, 0)),
        compiler_params=pltpu.CompilerParams(
            dimension_semantics=("parallel",)),
        cost_estimate=cost,
    )(xp, wb)
    return out[:, :, :Wo, :] if extra_w else out


# ----------------------------------------------------------------------------
# Plain-JAX glue: im2col (strided convs only), pooling, unpooling
# ----------------------------------------------------------------------------
def im2col(x, kh, kw, stride, padding, dilation):
    # Only used for the strided convs (initial 3x3/s2 and the 2x2/s2
    # projections); the 2x2/s2 case has zero memory blowup.
    B, H, W, C = x.shape
    ph, pw = padding
    xp = jnp.pad(x, ((0, 0), (ph, ph), (pw, pw), (0, 0)))
    Hp, Wp = H + 2 * ph, W + 2 * pw
    Ho = (Hp - dilation * (kh - 1) - 1) // stride + 1
    Wo = (Wp - dilation * (kw - 1) - 1) // stride + 1
    cols = []
    for i in range(kh):
        for j in range(kw):
            sl = xp[:, i * dilation: i * dilation + (Ho - 1) * stride + 1: stride,
                       j * dilation: j * dilation + (Wo - 1) * stride + 1: stride, :]
            cols.append(sl)
    return jnp.concatenate(cols, axis=-1), Ho, Wo


def conv_bn_act(x, w, stride=1, padding=(0, 0), dilation=1,
                act=ACT_ID, alpha=PRELU_ALPHA, bn=True, residual=None,
                film=None, out_dtype=jnp.bfloat16):
    kh, kw, cin, cout = w.shape
    wf = w * BN_SCALE if bn else w            # fold eval-mode BN into the weight
    B = x.shape[0]

    if kh == 1 and kw == 1 and stride == 1:
        H, W_ = x.shape[1], x.shape[2]
        Wm = wf.reshape(cin, cout)
        if film is not None:
            a, b = film
            Y = matmul_film_fused(x.reshape(B, H * W_, cin), Wm,
                                  residual.reshape(B, H * W_, cout), a, b,
                                  act=act, alpha=alpha)
            return Y.reshape(B, H, W_, cout)
        res = None if residual is None else residual.reshape(B * H * W_, cout)
        Y = matmul_fused(x.reshape(B * H * W_, cin), Wm, residual=res,
                         act=act, alpha=alpha, out_dtype=out_dtype)
        return Y.reshape(B, H, W_, cout)

    if stride == 1:
        # implicit-GEMM Pallas conv (no kh*kw im2col blowup through HBM)
        Wt = wf.reshape(kh * kw, cin, cout)
        return conv_s1(x, Wt, kh, kw, padding[0], padding[1], dilation,
                       act=act, alpha=alpha)

    # strided convs: im2col + fused matmul
    patches, Ho, Wo = im2col(x, kh, kw, stride, padding, dilation)
    X = patches.reshape(B * Ho * Wo, kh * kw * cin)
    res = None if residual is None else residual.reshape(B * Ho * Wo, cout)
    Y = matmul_fused(X, wf.reshape(kh * kw * cin, cout), residual=res,
                     act=act, alpha=alpha, out_dtype=out_dtype)
    return Y.reshape(B, Ho, Wo, cout)


def maxpool2x2(x):
    B, H, W, C = x.shape
    xr = x.reshape(B, H // 2, 2, W // 2, 2, C).transpose(0, 1, 3, 5, 2, 4)
    xr = xr.reshape(B, H // 2, W // 2, C, 4)
    return xr.max(axis=-1), jnp.argmax(xr, axis=-1).astype(jnp.int32)


def max_unpool2x2(x, idx):
    # TODO(synk): a dedicated Pallas select/scatter kernel could interleave the
    # 2x2 phases directly; the where-based phase build avoids the one_hot
    # multiply and is acceptable at these sizes.
    B, Hs, Ws, C = x.shape
    phases = [jnp.where(idx == k, x, jnp.zeros_like(x)) for k in range(4)]
    y = jnp.stack(phases, axis=-1).reshape(B, Hs, Ws, C, 2, 2)
    y = y.transpose(0, 1, 4, 2, 5, 3).reshape(B, 2 * Hs, 2 * Ws, C)
    return y


def maxpool3x3_s2_p1(x):
    return jax.lax.reduce_window(x, -jnp.inf, jax.lax.max,
                                 (1, 3, 3, 1), (1, 2, 2, 1),
                                 [(0, 0), (1, 1), (1, 1), (0, 0)])


def avgpool14(x):
    B, H, W, C = x.shape
    Ho, Wo = H // 14, W // 14
    xc = x[:, :Ho * 14, :Wo * 14, :].astype(jnp.float32)
    return xc.reshape(B, Ho, 14, Wo, 14, C).mean(axis=(2, 4))


# ----------------------------------------------------------------------------
# ENet blocks
# ----------------------------------------------------------------------------
def initial_block(x, w, alpha):
    # main: 3x3/s2 conv, BN+PReLU fused in the matmul epilogue
    main = conv_bn_act(x, w, stride=2, padding=(1, 1), act=ACT_PRELU, alpha=alpha)
    # ext: 3x3/s2 maxpool; its 3-channel BN+PReLU is trivial plain-JAX glue
    ext = maxpool3x3_s2_p1(x) * BN_SCALE
    ext = jnp.where(ext >= 0.0, ext, alpha * ext).astype(main.dtype)
    return jnp.concatenate([main, ext], axis=-1)


def regular_bottleneck(x, bp, act, alpha, padding=1, dilation=1,
                       asymmetric=False, film=None):
    ext = conv_bn_act(x, bp['w1'], act=act, alpha=alpha)
    if asymmetric:
        ext = conv_bn_act(ext, bp['w2a'], padding=(padding, 0), act=act, alpha=alpha)
        ext = conv_bn_act(ext, bp['w2b'], padding=(0, padding), act=act, alpha=alpha)
    else:
        ext = conv_bn_act(ext, bp['w2'], padding=(padding, padding),
                          dilation=dilation, act=act, alpha=alpha)
    # 1x1 expansion + BN + act + residual + out-act (+ optional FiLM/ReLU6) fused
    return conv_bn_act(ext, bp['w3'], act=act, alpha=alpha, residual=x, film=film)


def downsampling_bottleneck(x, bp, out_channels, act, alpha):
    main, idx = maxpool2x2(x)
    B, Hs, Ws, Cm = main.shape
    mainp = jnp.concatenate(
        [main, jnp.zeros((B, Hs, Ws, out_channels - Cm), main.dtype)], axis=-1)
    ext = conv_bn_act(x, bp['w1'], stride=2, act=act, alpha=alpha)
    ext = conv_bn_act(ext, bp['w2'], padding=(1, 1), act=act, alpha=alpha)
    out = conv_bn_act(ext, bp['w3'], act=act, alpha=alpha, residual=mainp)
    return out, idx


def upsampling_bottleneck(x, idx, bp, act, alpha):
    # main: 1x1 conv + BN (no activation), then max-unpool
    main = conv_bn_act(x, bp['mw'], act=ACT_ID)
    main = max_unpool2x2(main, idx)
    # ext: 1x1 proj -> tconv2x2/s2 (per-pixel matmul, BN folded, act fused) -> 1x1
    ext = conv_bn_act(x, bp['w1'], act=act, alpha=alpha)
    B, Hs, Ws, Ci = ext.shape
    tw = bp['tw']                                        # (Cin, 2, 2, Cout)
    Cout = tw.shape[-1]
    Y = matmul_fused(ext.reshape(B * Hs * Ws, Ci),
                     (tw * BN_SCALE).reshape(Ci, 4 * Cout),
                     act=act, alpha=alpha)
    Y = Y.reshape(B, Hs, Ws, 2, 2, Cout).transpose(0, 1, 3, 2, 4, 5)
    ext = Y.reshape(B, 2 * Hs, 2 * Ws, Cout)
    # final 1x1 expansion + residual(main) + out-activation fused in epilogue
    return conv_bn_act(ext, bp['w2'], act=act, alpha=alpha, residual=main)


def conv_transpose_final(x, w):
    # ConvTranspose2d(16, 5, k=3, s=2, p=1, output_padding=1, bias=False)
    # via sub-pixel (phase) decomposition: out[o] += x[i] * w[k], o = 2i-1+k.
    B, H, W, Cin = x.shape
    Cout = w.shape[-1]
    xp = jnp.pad(x, ((0, 0), (0, 1), (0, 1), (0, 0)))
    p00 = xp[:, :H, :W, :]
    p01 = xp[:, :H, 1:W + 1, :]
    p10 = xp[:, 1:H + 1, :W, :]
    p11 = xp[:, 1:H + 1, 1:W + 1, :]
    patches = jnp.concatenate([p00, p01, p10, p11], axis=-1)     # (B,H,W,4*Cin)

    Z = jnp.zeros((Cin, Cout), w.dtype)
    Wee = jnp.concatenate([w[1, 1], Z, Z, Z], axis=0)
    Weo = jnp.concatenate([w[1, 2], w[1, 0], Z, Z], axis=0)
    Woe = jnp.concatenate([w[2, 1], Z, w[0, 1], Z], axis=0)
    Woo = jnp.concatenate([w[2, 2], w[2, 0], w[0, 2], w[0, 0]], axis=0)
    Wc = jnp.concatenate([Wee, Weo, Woe, Woo], axis=1)           # (4Cin, 4Cout)

    Y = matmul_fused(patches.reshape(B * H * W, 4 * Cin), Wc,
                     act=ACT_ID, out_dtype=jnp.float32)
    Y = Y.reshape(B, H, W, 2, 2, Cout).transpose(0, 1, 3, 2, 4, 5)
    return Y.reshape(B, 2 * H, 2 * W, Cout)


# ----------------------------------------------------------------------------
# Parameters (deterministic, synthetic init; FC sizes adapt to input size)
# ----------------------------------------------------------------------------
def build_params(key, fc_dim):
    keys = iter(jax.random.split(key, 256))

    def convw(kh, kw, ci, co):
        return (jax.random.normal(next(keys), (kh, kw, ci, co), jnp.float32)
                / math.sqrt(kh * kw * ci))

    def linw(ci, co):
        w = jax.random.normal(next(keys), (ci, co), jnp.float32) / math.sqrt(ci)
        b = jax.random.normal(next(keys), (co,), jnp.float32) * 0.01
        return (w, b)

    def reg(ch, internal, asym=False, k=3):
        d = {'w1': convw(1, 1, ch, internal), 'w3': convw(1, 1, internal, ch)}
        if asym:
            d['w2a'] = convw(k, 1, internal, internal)
            d['w2b'] = convw(1, k, internal, internal)
        else:
            d['w2'] = convw(3, 3, internal, internal)
        return d

    p = {}
    p['initial_w'] = convw(3, 3, 3, 13)
    # Reference hard-codes Linear(4480, 4096) for 288x800 inputs; fc_dim is
    # derived from the (small) test spatial size here.
    p['fc1'] = linw(fc_dim, 4096)
    p['fc2'] = linw(4096, 1024)
    p['ds1'] = {'w1': convw(2, 2, 16, 4), 'w2': convw(3, 3, 4, 4),
                'w3': convw(1, 1, 4, 64)}
    p['reg1'] = [reg(64, 16) for _ in range(4)]
    p['gamma1'], p['beta1'] = linw(1024, 64), linw(1024, 64)
    p['ds2'] = {'w1': convw(2, 2, 64, 16), 'w2': convw(3, 3, 16, 16),
                'w3': convw(1, 1, 16, 128)}
    p['s2'] = [reg(128, 32, asym=(i in (2, 6)), k=5) for i in range(8)]
    p['gamma2'], p['beta2'] = linw(1024, 128), linw(1024, 128)
    p['s3'] = [reg(128, 32, asym=(i in (2, 6)), k=5) for i in range(8)]
    p['gamma3'], p['beta3'] = linw(1024, 128), linw(1024, 128)
    p['up4'] = {'mw': convw(1, 1, 128, 64), 'w1': convw(1, 1, 128, 32),
                'tw': jax.random.normal(next(keys), (32, 2, 2, 32), jnp.float32)
                      / math.sqrt(32 * 4),
                'w2': convw(1, 1, 32, 64)}
    p['reg4'] = [reg(64, 16) for _ in range(2)]
    p['up5'] = {'mw': convw(1, 1, 64, 16), 'w1': convw(1, 1, 64, 16),
                'tw': jax.random.normal(next(keys), (16, 2, 2, 16), jnp.float32)
                      / math.sqrt(16 * 4),
                'w2': convw(1, 1, 16, 16)}
    p['reg5'] = reg(16, 4)
    p['tconv_w'] = convw(3, 3, 16, 5)    # transposed-conv taps, (kh,kw,Cin,Cout)
    p['cls'] = linw(1024, 2)
    return p


# ----------------------------------------------------------------------------
# Full forward pass  (seg_gt=None path; class loss computed against `target`)
# ----------------------------------------------------------------------------
def enet_forward(p, x_nchw, target):
    alpha = PRELU_ALPHA
    ENC, DEC = ACT_PRELU, ACT_RELU            # encoder_relu=False, decoder_relu=True
    x = jnp.transpose(x_nchw, (0, 2, 3, 1))   # NCHW -> NHWC
    B = x.shape[0]

    x = initial_block(x, p['initial_w'], alpha)

    # FC branch (Linear bias kept; Dropout(0.2) in eval mode -> identity)
    pooled = avgpool14(x)
    fc_in = jnp.transpose(pooled, (0, 3, 1, 2)).reshape(B, -1)   # channel-major flatten
    h = matmul_fused(fc_in, p['fc1'][0], bias=p['fc1'][1],
                     act=ACT_RELU, out_dtype=jnp.float32)
    fc = matmul_fused(h, p['fc2'][0], bias=p['fc2'][1],
                      act=ACT_RELU, out_dtype=jnp.float32)
    # TODO(synk): nn.Dropout(0.2) in FC_initial implemented in eval mode (identity).

    # All six FiLM heads (Linear + ReLU) in one fused matmul
    Wf = jnp.concatenate([p['gamma1'][0], p['beta1'][0], p['gamma2'][0],
                          p['beta2'][0], p['gamma3'][0], p['beta3'][0]], axis=1)
    bf = jnp.concatenate([p['gamma1'][1], p['beta1'][1], p['gamma2'][1],
                          p['beta2'][1], p['gamma3'][1], p['beta3'][1]], axis=0)
    film = matmul_fused(fc, Wf, bias=bf, act=ACT_RELU, out_dtype=jnp.float32)
    g1, b1 = film[:, 0:64], film[:, 64:128]
    g2, b2 = film[:, 128:256], film[:, 256:384]
    g3, b3 = film[:, 384:512], film[:, 512:640]
    film1, film2, film3 = (1.0 - g1, b1), (1.0 - g2, b2), (1.0 - g3, b3)

    # Stage 1 (FiLM condition fused into the last bottleneck's expansion conv)
    x, idx1 = downsampling_bottleneck(x, p['ds1'], 64, ENC, alpha)
    for i, bp in enumerate(p['reg1']):
        f = film1 if i == len(p['reg1']) - 1 else None
        x = regular_bottleneck(x, bp, ENC, alpha, padding=1, film=f)

    # Stage 2
    x, idx2 = downsampling_bottleneck(x, p['ds2'], 128, ENC, alpha)
    cfg = [(1, 1, False), (2, 2, False), (2, 1, True), (4, 4, False),
           (1, 1, False), (8, 8, False), (2, 1, True), (16, 16, False)]
    for i, (bp, (pad, dil, asym)) in enumerate(zip(p['s2'], cfg)):
        f = film2 if i == len(cfg) - 1 else None
        x = regular_bottleneck(x, bp, ENC, alpha, padding=pad, dilation=dil,
                               asymmetric=asym, film=f)

    # Stage 3
    for i, (bp, (pad, dil, asym)) in enumerate(zip(p['s3'], cfg)):
        f = film3 if i == len(cfg) - 1 else None
        x = regular_bottleneck(x, bp, ENC, alpha, padding=pad, dilation=dil,
                               asymmetric=asym, film=f)

    # Decoder
    x = upsampling_bottleneck(x, idx2, p['up4'], DEC, alpha)
    for bp in p['reg4']:
        x = regular_bottleneck(x, bp, DEC, alpha, padding=1)
    x = upsampling_bottleneck(x, idx1, p['up5'], DEC, alpha)
    x = regular_bottleneck(x, p['reg5'], DEC, alpha, padding=1)

    seg = conv_transpose_final(x, p['tconv_w'])          # (B, H, W, 5)
    seg_pred = jnp.transpose(seg, (0, 3, 1, 2))          # back to NCHW

    # classifier head + losses (seg_gt is None -> loss_seg = 0)
    class_out = matmul_fused(fc, p['cls'][0], bias=p['cls'][1],
                             act=ACT_ID, out_dtype=jnp.float32)
    # matches the reference's CrossEntropyLoss(softmax(class_out), target) quirk
    score = jax.nn.softmax(class_out, axis=1)
    logp = jax.nn.log_softmax(score, axis=1)
    class_loss = -jnp.mean(jnp.take_along_axis(logp, target[:, None], axis=1))
    loss = class_loss                                    # loss_seg = 0 (seg_gt None)
    return seg_pred, loss


# ----------------------------------------------------------------------------
if __name__ == "__main__":
    key = jax.random.PRNGKey(0)
    kp, kx = jax.random.split(key)

    # Small input consistent with the module's structure:
    # 32x64 -> initial block 16x32 (>=14 so AvgPool(14) works) -> fc_dim = 16*1*2
    H, W = 32, 64
    x = jax.random.normal(kx, (2, 3, H, W), jnp.float32)
    target = jnp.array([0, 1], dtype=jnp.int32)
    fc_dim = 16 * ((H // 2) // 14) * ((W // 2) // 14)

    params = build_params(kp, fc_dim)

    seg_pred, loss = enet_forward(params, x, target)
    jax.block_until_ready((seg_pred, loss))
    assert seg_pred.shape == (2, 5, H, W)
    assert loss.shape == ()
    print("KERNEL_OK")
</pallas_src>

<mosaic_0001>
module attributes {stable_mosaic.version = 11 : i64} {
  func.func @_mm_kernel(%arg0: i32, %arg1: i32, %arg2: i32, %arg3: memref<1024x27xbf16, #tpu.memory_space<vmem>>, %arg4: memref<27x128xbf16, #tpu.memory_space<vmem>>, %arg5: memref<1024x128xbf16, #tpu.memory_space<vmem>>) attributes {dimension_semantics = [#tpu.dimension_semantics<parallel>, #tpu.dimension_semantics<parallel>, #tpu.dimension_semantics<arbitrary>], iteration_bounds = array<i64: 1, 1, 1>, scalar_prefetch = 0 : i64, scratch_operands = 0 : i64, tpu.core_type = #tpu.core_type<tc>, window_params = [{transform_indices = @transform_0, window_bounds = array<i64: 1024, 27>}, {transform_indices = @transform_1, window_bounds = array<i64: 27, 128>}, {transform_indices = @transform_2, window_bounds = array<i64: 1024, 128>}]} {
    %c0 = arith.constant 0 : index
    %c0_0 = arith.constant 0 : index
    %0 = vector.load %arg3[%c0, %c0_0] : memref<1024x27xbf16, #tpu.memory_space<vmem>>, vector<1024x27xbf16>
    %c0_1 = arith.constant 0 : index
    %c0_2 = arith.constant 0 : index
    %1 = vector.load %arg4[%c0_1, %c0_2] : memref<27x128xbf16, #tpu.memory_space<vmem>>, vector<27x128xbf16>
    %cst = arith.constant dense<0.000000e+00> : vector<1024x128xf32>
    %2 = tpu.matmul %0, %1, %cst {dimension_numbers = #tpu.dot_dimension_numbers<[1], [0], [0], [1], [0, 0, 1, 1], [], []>} : vector<1024x27xbf16>, vector<27x128xbf16>, vector<1024x128xf32> -> vector<1024x128xf32>
    %cst_3 = arith.constant 0.000000e+00 : f32
    %3 = vector.broadcast %cst_3 : f32 to vector<1024x128xf32>
    %4 = arith.cmpf oge, %2, %3 : vector<1024x128xf32>
    %cst_4 = arith.constant 2.500000e-01 : f32
    %5 = vector.broadcast %cst_4 : f32 to vector<1024x128xf32>
    %6 = arith.mulf %5, %2 : vector<1024x128xf32>
    %7 = arith.select %4, %2, %6 : vector<1024x128xi1>, vector<1024x128xf32>
    %8 = arith.truncf %7 : vector<1024x128xf32> to vector<1024x128xbf16>
    %c0_5 = arith.constant 0 : index
    %c0_6 = arith.constant 0 : index
    %9 = vector.load %arg5[%c0_5, %c0_6] : memref<1024x128xbf16, #tpu.memory_space<vmem>>, vector<1024x128xbf16>
    tpu.vector_store %arg5[%c0_5, %c0_6], %8 {strides = array<i32>} : memref<1024x128xbf16, #tpu.memory_space<vmem>>, vector<1024x128xbf16>,
    return
  }
  func.func @transform_0(%arg0: i32, %arg1: i32, %arg2: i32) -> (i32, i32) {
    %c0_i32 = arith.constant 0 : i32
    return %arg0, %arg2 : i32, i32
  }
  func.func @transform_1(%arg0: i32, %arg1: i32, %arg2: i32) -> (i32, i32) {
    %c0_i32 = arith.constant 0 : i32
    return %arg2, %arg1 : i32, i32
  }
  func.func @transform_2(%arg0: i32, %arg1: i32, %arg2: i32) -> (i32, i32) {
    %c0_i32 = arith.constant 0 : i32
    return %arg0, %arg1 : i32, i32
  }
}

</mosaic_0001>

<bundles_post_ra>
// kernel: matmul_fused.1
= control target key start
LH: loop header
LB: loop body
LE: loop exit
PB: predicated region body
PF: predicated region fallthrough
CT: control target
= control target key end

     0   :  { %vm668_vm0 = vcmask 1044480   ;;  %vm669_vm1 = vcmask 1045504   ;;  %vm475_vm2 = vcmask 220160   ;;  %v3286_v1 = vmov 65535   ;;  %s3819_s1 = inlined_call_operand.vmem [shape: bf16[27,128], index: 1, kind: input, shape index: {}]   ;;  %s3820_s0 = inlined_call_operand.vmem [shape: bf16[1024,27], index: 0, kind: input, shape index: {}]   ;;  %s3821_s2 = inlined_call_operand.vmem [shape: bf16[1024,128], index: 2, kind: output, shape index: {}]  }
   0x1   :  { %v3220_v0 = vld [vmem:[%s3819_s1] sm:$0xff]   ;;  %v670_v2 = vsel %vm668_vm0, 4294967295, %v3286_v1  ;;  %v3221_v3 = vld [vmem:[%s3819_s1 + $0x8] sm:$0x3f]   ;;  %v3226_v10 = vld [vmem:[%s3820_s0 + $0x10] sm:$0xff]  }
   0x2   :  { %3083 = vmatprep.subr.bf16.mxu0 %v3220_v0  ;;  %3215 = vmatprep.subr.bf16.mxu1 %v3220_v0  ;;  %v671_v4 = vsel %vm669_vm1, %v670_v2, 0  ;;  %v3222_v5 = vld [vmem:[%s3820_s0] sm:$0xff]   ;;  %v3224_v8 = vld [vmem:[%s3820_s0 + $0x8] sm:$0xff]   ;;  %v3227_v11 = vld [vmem:[%s3820_s0 + $0x110] sm:$0xff]  }
   0x3   :  { %3084 = vmatpush3.bf16.msra.mxu0 %v3220_v0  ;;  %3217 = vmatpush3.bf16.msra.mxu1 %v3220_v0  ;;  %v673_v6 = vand.u32 %v3221_v3, %v671_v4  ;;  %v3223_v7 = vld [vmem:[%s3820_s0 + $0x100] sm:$0xff]   ;;  %v3225_v9 = vld [vmem:[%s3820_s0 + $0x108] sm:$0xff]   ;;  %v3228_v12 = vld [vmem:[%s3820_s0 + $0x18] sm:$0xff]  }
   0x4   :  { %3087 = vmatprep.mubr.msk.bf16.mxu0 %vm475_vm2, %v3222_v5  ;;  %3151 = vmatprep.mubr.msk.bf16.mxu1 %vm475_vm2, %v3223_v7  ;;  %v3229_v13 = vld [vmem:[%s3820_s0 + $0x118] sm:$0xff]   ;;  %v3230_v14 = vld [vmem:[%s3820_s0 + $0x20] sm:$0xff]   ;;  %v3232_v16 = vld [vmem:[%s3820_s0 + $0x28] sm:$0xff]  }
   0x5   :  { %3085 = vmatprep.subr.bf16.mxu0 %v673_v6  ;;  %3216 = vmatprep.subr.bf16.mxu1 %v673_v6  ;;  %v3231_v15 = vld [vmem:[%s3820_s0 + $0x120] sm:$0xff]   ;;  %v3233_v17 = vld [vmem:[%s3820_s0 + $0x128] sm:$0xff]   ;;  %v3234_v18 = vld [vmem:[%s3820_s0 + $0x30] sm:$0xff]  }
   0x6   :  { %v3235_v19 = vld [vmem:[%s3820_s0 + $0x130] sm:$0xff]   ;;  %v3236_v20 = vld [vmem:[%s3820_s0 + $0x38] sm:$0xff]   ;;  %v3238_v22 = vld [vmem:[%s3820_s0 + $0x40] sm:$0xff]  }
   0x7   :  { %3086 = vmatpush3.bf16.msra.mxu0 %v673_v6  ;;  %3218 = vmatpush3.bf16.msra.mxu1 %v673_v6  ;;  %v3237_v21 = vld [vmem:[%s3820_s0 + $0x138] sm:$0xff]   ;;  %v3239_v23 = vld [vmem:[%s3820_s0 + $0x140] sm:$0xff]   ;;  %v3240_v24 = vld [vmem:[%s3820_s0 + $0x48] sm:$0xff]  }
   0x8   :  { %v3241_v25 = vld [vmem:[%s3820_s0 + $0x148] sm:$0xff]   ;;  %v3242_v26 = vld [vmem:[%s3820_s0 + $0x50] sm:$0xff]   ;;  %v3244_v28 = vld [vmem:[%s3820_s0 + $0x58] sm:$0xff]  }
   0x9   :  { %v3243_v27 = vld [vmem:[%s3820_s0 + $0x150] sm:$0xff]   ;;  %v3245_v29 = vld [vmem:[%s3820_s0 + $0x158] sm:$0xff]   ;;  %v3246_v30 = vld [vmem:[%s3820_s0 + $0x60] sm:$0xff]  }
   0xa   :  { %3088 = vmatmul.mubr.msk.bf16.vlgmr.msra.gmra.mrb[0].mxu0 %vm475_vm2, %v3224_v8  ;;  %3152 = vmatmul.mubr.msk.bf16.vlgmr.msra.gmra.mrb[0].mxu1 %vm475_vm2, %v3225_v9  ;;  %v3247_v31 = vld [vmem:[%s3820_s0 + $0x160] sm:$0xff]   ;;  %v3248_v32 = vld [vmem:[%s3820_s0 + $0x68] sm:$0xff]   ;;  %v3250_v34 = vld [vmem:[%s3820_s0 + $0x70] sm:$0xff]  }
   0xb   :  { %3091 = vmatprep.mubr.msk.bf16.mxu0 %vm475_vm2, %v3226_v10  ;;  %3155 = vmatprep.mubr.msk.bf16.mxu1 %vm475_vm2, %v3227_v11  ;;  %v3249_v33 = vld [vmem:[%s3820_s0 + $0x168] sm:$0xff]   ;;  %v3251_v35 = vld [vmem:[%s3820_s0 + $0x170] sm:$0xff]   ;;  %v3252_v36 = vld [vmem:[%s3820_s0 + $0x78] sm:$0xff]  }
   0xc   :  { %v3253_v37 = vld [vmem:[%s3820_s0 + $0x178] sm:$0xff]   ;;  %v3254_v38 = vld [vmem:[%s3820_s0 + $0x80] sm:$0xff]   ;;  %v3256_v40 = vld [vmem:[%s3820_s0 + $0x88] sm:$0xff]  }
   0xd   :  { %v3255_v39 = vld [vmem:[%s3820_s0 + $0x180] sm:$0xff]   ;;  %v3257_v41 = vld [vmem:[%s3820_s0 + $0x188] sm:$0xff]   ;;  %v3258_v42 = vld [vmem:[%s3820_s0 + $0x90] sm:$0xff]  }
   0xe   :  { %v3259_v43 = vld [vmem:[%s3820_s0 + $0x190] sm:$0xff]   ;;  %v3260_v44 = vld [vmem:[%s3820_s0 + $0x98] sm:$0xff]   ;;  %v3262_v46 = vld [vmem:[%s3820_s0 + $0xa0] sm:$0xff]  }
   0xf   :  { %v3261_v45 = vld [vmem:[%s3820_s0 + $0x198] sm:$0xff]   ;;  %v3263_v47 = vld [vmem:[%s3820_s0 + $0x1a0] sm:$0xff]   ;;  %v3264_v48 = vld [vmem:[%s3820_s0 + $0xa8] sm:$0xff]  }
  0x10   :  { %v3265_v49 = vld [vmem:[%s3820_s0 + $0x1a8] sm:$0xff]   ;;  %v3266_v50 = vld [vmem:[%s3820_s0 + $0xb0] sm:$0xff]   ;;  %v3268_v52 = vld [vmem:[%s3820_s0 + $0xb8] sm:$0xff]  }
  0x11   :  { %v3267_v51 = vld [vmem:[%s3820_s0 + $0x1b0] sm:$0xff]   ;;  %v3269_v53 = vld [vmem:[%s3820_s0 + $0x1b8] sm:$0xff]   ;;  %v3270_v54 = vld [vmem:[%s3820_s0 + $0xc0] sm:$0xff]  }
  0x12   :  { %3092 = vmatmul.mubr.msk.bf16.gmra.mrb[4].mxu0 %vm475_vm2, %v3228_v12  ;;  %3156 = vmatmul.mubr.msk.bf16.gmra.mrb[4].mxu1 %vm475_vm2, %v3229_v13  ;;  %v3271_v55 = vld [vmem:[%s3820_s0 + $0x1c0] sm:$0xff]   ;;  %v3272_v56 = vld [vmem:[%s3820_s0 + $0xc8] sm:$0xff]   ;;  %v3274_v58 = vld [vmem:[%s3820_s0 + $0xd0] sm:$0xff]  }
  0x13   :  { %3095 = vmatprep.mubr.msk.bf16.mxu0 %vm475_vm2, %v3230_v14  ;;  %3159 = vmatprep.mubr.msk.bf16.mxu1 %vm475_vm2, %v3231_v15  ;;  %v3273_v57 = vld [vmem:[%s3820_s0 + $0x1c8] sm:$0xff]   ;;  %v3275_v59 = vld [vmem:[%s3820_s0 + $0x1d0] sm:$0xff]   ;;  %v3276_v60 = vld [vmem:[%s3820_s0 + $0xd8] sm:$0xff]  }
  0x14   :  { %v3277_v61 = vld [vmem:[%s3820_s0 + $0x1d8] sm:$0xff]   ;;  %v3278_v62 = vld [vmem:[%s3820_s0 + $0xe0] sm:$0xff]   ;;  %v3280_v0 = vld [vmem:[%s3820_s0 + $0xe8] sm:$0xff]  }
  0x15   :  { %v3279_v63 = vld [vmem:[%s3820_s0 + $0x1e0] sm:$0xff]   ;;  %v3281_v1 = vld [vmem:[%s3820_s0 + $0x1e8] sm:$0xff]   ;;  %v3282_v2 = vld [vmem:[%s3820_s0 + $0xf0] sm:$0xff]  }
  0x16   :  { %v3283_v3 = vld [vmem:[%s3820_s0 + $0x1f0] sm:$0xff]   ;;  %v3284_v4 = vld [vmem:[%s3820_s0 + $0xf8] sm:$0xff]  }
  0x17   :  { %v3285_v5 = vld [vmem:[%s3820_s0 + $0x1f8] sm:$0xff]  }
  0x1a   :  { %3096 = vmatmul.mubr.msk.bf16.gmra.mrb[8].mxu0 %vm475_vm2, %v3232_v16  ;;  %3160 = vmatmul.mubr.msk.bf16.gmra.mrb[8].mxu1 %vm475_vm2, %v3233_v17 }
  0x1b   :  { %3099 = vmatprep.mubr.msk.bf16.mxu0 %vm475_vm2, %v3234_v18  ;;  %3163 = vmatprep.mubr.msk.bf16.mxu1 %vm475_vm2, %v3235_v19 }
  0x22   :  { %3100 = vmatmul.mubr.msk.bf16.gmra.mrb[12].mxu0 %vm475_vm2, %v3236_v20  ;;  %3164 = vmatmul.mubr.msk.bf16.gmra.mrb[12].mxu1 %vm475_vm2, %v3237_v21 }
  0x23   :  { %3103 = vmatprep.mubr.msk.bf16.mxu0 %vm475_vm2, %v3238_v22  ;;  %3167 = vmatprep.mubr.msk.bf16.mxu1 %vm475_vm2, %v3239_v23 }
  0x2a   :  { %3104 = vmatmul.mubr.msk.bf16.gmra.mrb[16].mxu0 %vm475_vm2, %v3240_v24  ;;  %3168 = vmatmul.mubr.msk.bf16.gmra.mrb[16].mxu1 %vm475_vm2, %v3241_v25 }
  0x2b   :  { %3107 = vmatprep.mubr.msk.bf16.mxu0 %vm475_vm2, %v3242_v26  ;;  %3171 = vmatprep.mubr.msk.bf16.mxu1 %vm475_vm2, %v3243_v27 }
  0x32   :  { %3108 = vmatmul.mubr.msk.bf16.gmra.mrb[20].mxu0 %vm475_vm2, %v3244_v28  ;;  %3172 = vmatmul.mubr.msk.bf16.gmra.mrb[20].mxu1 %vm475_vm2, %v3245_v29 }
  0x33   :  { %3111 = vmatprep.mubr.msk.bf16.mxu0 %vm475_vm2, %v3246_v30  ;;  %3175 = vmatprep.mubr.msk.bf16.mxu1 %vm475_vm2, %v3247_v31 }
  0x3a   :  { %3112 = vmatmul.mubr.msk.bf16.gmra.mrb[24].mxu0 %vm475_vm2, %v3248_v32  ;;  %3176 = vmatmul.mubr.msk.bf16.gmra.mrb[24].mxu1 %vm475_vm2, %v3249_v33 }
  0x3b   :  { %3115 = vmatprep.mubr.msk.bf16.mxu0 %vm475_vm2, %v3250_v34  ;;  %3179 = vmatprep.mubr.msk.bf16.mxu1 %vm475_vm2, %v3251_v35 }
  0x42   :  { %3116 = vmatmul.mubr.msk.bf16.gmra.mrb[28].mxu0 %vm475_vm2, %v3252_v36  ;;  %3180 = vmatmul.mubr.msk.bf16.gmra.mrb[28].mxu1 %vm475_vm2, %v3253_v37 }
  0x43   :  { %3119 = vmatprep.mubr.msk.bf16.mxu0 %vm475_vm2, %v3254_v38  ;;  %3183 = vmatprep.mubr.msk.bf16.mxu1 %vm475_vm2, %v3255_v39 }
  0x4a   :  { %3120 = vmatmul.mubr.msk.bf16.gmra.mrb[32].mxu0 %vm475_vm2, %v3256_v40  ;;  %3184 = vmatmul.mubr.msk.bf16.gmra.mrb[32].mxu1 %vm475_vm2, %v3257_v41 }
  0x4b   :  { %3123 = vmatprep.mubr.msk.bf16.mxu0 %vm475_vm2, %v3258_v42  ;;  %3187 = vmatprep.mubr.msk.bf16.mxu1 %vm475_vm2, %v3259_v43 }
  0x52   :  { %3124 = vmatmul.mubr.msk.bf16.gmra.mrb[36].mxu0 %vm475_vm2, %v3260_v44  ;;  %3188 = vmatmul.mubr.msk.bf16.gmra.mrb[36].mxu1 %vm475_vm2, %v3261_v45 }
  0x53   :  { %3127 = vmatprep.mubr.msk.bf16.mxu0 %vm475_vm2, %v3262_v46  ;;  %3191 = vmatprep.mubr.msk.bf16.mxu1 %vm475_vm2, %v3263_v47 }
  0x5a   :  { %3128 = vmatmul.mubr.msk.bf16.gmra.mrb[40].mxu0 %vm475_vm2, %v3264_v48  ;;  %3192 = vmatmul.mubr.msk.bf16.gmra.mrb[40].mxu1 %vm475_vm2, %v3265_v49 }
  0x5b   :  { %3131 = vmatprep.mubr.msk.bf16.mxu0 %vm475_vm2, %v3266_v50  ;;  %3195 = vmatprep.mubr.msk.bf16.mxu1 %vm475_vm2, %v3267_v51 }
  0x62   :  { %3132 = vmatmul.mubr.msk.bf16.gmra.mrb[44].mxu0 %vm475_vm2, %v3268_v52  ;;  %3196 = vmatmul.mubr.msk.bf16.gmra.mrb[44].mxu1 %vm475_vm2, %v3269_v53 }
  0x63   :  { %3135 = vmatprep.mubr.msk.bf16.mxu0 %vm475_vm2, %v3270_v54  ;;  %3199 = vmatprep.mubr.msk.bf16.mxu1 %vm475_vm2, %v3271_v55 }
  0x6a   :  { %3136 = vmatmul.mubr.msk.bf16.gmra.mrb[48].mxu0 %vm475_vm2, %v3272_v56  ;;  %3200 = vmatmul.mubr.msk.bf16.gmra.mrb[48].mxu1 %vm475_vm2, %v3273_v57 }
  0x6b   :  { %3139 = vmatprep.mubr.msk.bf16.mxu0 %vm475_vm2, %v3274_v58  ;;  %3203 = vmatprep.mubr.msk.bf16.mxu1 %vm475_vm2, %v3275_v59 }
  0x72   :  { %3140 = vmatmul.mubr.msk.bf16.gmra.mrb[52].mxu0 %vm475_vm2, %v3276_v60  ;;  %3204 = vmatmul.mubr.msk.bf16.gmra.mrb[52].mxu1 %vm475_vm2, %v3277_v61 }
  0x73   :  { %3143 = vmatprep.mubr.msk.bf16.mxu0 %vm475_vm2, %v3278_v62  ;;  %3207 = vmatprep.mubr.msk.bf16.mxu1 %vm475_vm2, %v3279_v63 }
  0x7a   :  { %3144 = vmatmul.mubr.msk.bf16.gmra.mrb[56].mxu0 %vm475_vm2, %v3280_v0  ;;  %3208 = vmatmul.mubr.msk.bf16.gmra.mrb[56].mxu1 %vm475_vm2, %v3281_v1 }
  0x7b   :  { %3147 = vmatprep.mubr.msk.bf16.mxu0 %vm475_vm2, %v3282_v2  ;;  %3211 = vmatprep.mubr.msk.bf16.mxu1 %vm475_vm2, %v3283_v3 }
  0x82   :  { %3148 = vmatmul.mubr.msk.bf16.gmra.mrb[60].mxu0 %vm475_vm2, %v3284_v4  ;;  %3212 = vmatmul.mubr.msk.bf16.gmra.mrb[60].mxu1 %vm475_vm2, %v3285_v5 }
  0xdd   :  { %v3089_v6 = vpop.f32.mrb[0].mxu0  ;;  %v3153_v7 = vpop.f32.mrb[0].mxu1 }
  0xde   :  { %vm1222_vm3 = vcmp.ge.f32.partialorder %v3089_v6, 0.0  ;;  %v1350_v8 = vmul.f32 0.25, %v3089_v6  ;;  %v709_v9 = vpop.f32.mrb[1].mxu0  ;;  %v965_v10 = vpop.f32.mrb[1].mxu1  ;;  %vm1286_vm4 = vcmp.ge.f32.partialorder %v3153_v7, 0.0  ;;  %v1414_v11 = vmul.f32 0.25, %v3153_v7 }
  0xdf   :  { %vm1220_vm5 = vcmp.ge.f32.partialorder %v709_v9, 0.0  ;;  %v3090_v12 = vpop.f32.mrb[2].mxu0  ;;  %v3154_v13 = vpop.f32.mrb[2].mxu1  ;;  %v1348_v14 = vmul.f32 0.25, %v709_v9  ;;  %vm1284_vm6 = vcmp.ge.f32.partialorder %v965_v10, 0.0  ;;  %v1412_v19 = vmul.f32 0.25, %v965_v10 }
  0xe0   :  { %vm1223_vm7 = vcmp.ge.f32.partialorder %v3090_v12, 0.0  ;;  %v1351_v15 = vmul.f32 0.25, %v3090_v12  ;;  %v712_v16 = vpop.f32.mrb[3].mxu0  ;;  %v968_v17 = vpop.f32.mrb[3].mxu1  ;;  %v1478_v18 = vsel %vm1222_vm3, %v3089_v6, %v1350_v8  ;;  %vm1287_vm8 = vcmp.ge.f32.partialorder %v3154_v13, 0.0 }
  0xe1   :  { %v1415_v20 = vmul.f32 0.25, %v3154_v13  ;;  %vm1221_vm9 = vcmp.ge.f32.partialorder %v712_v16, 0.0  ;;  %v1349_v22 = vmul.f32 0.25, %v712_v16  ;;  %vm1285_vm10 = vcmp.ge.f32.partialorder %v968_v17, 0.0 }
  0xe2   :  { %v1479_v21 = vsel %vm1223_vm7, %v3090_v12, %v1351_v15  ;;  %v1542_v23 = vsel %vm1286_vm4, %v3153_v7, %v1414_v11  ;;  %v1413_v26 = vmul.f32 0.25, %v968_v17  ;;  %v1476_v27 = vsel %vm1220_vm5, %v709_v9, %v1348_v14 }
  0xe3   :  { %v2642_v24 = vpack.c.bf16 %v1479_v21, %v1478_v18  ;;  %v1543_v25 = vsel %vm1287_vm8, %v3154_v13, %v1415_v20  ;;  %v1477_v29 = vsel %vm1221_vm9, %v712_v16, %v1349_v22  ;;  %v1540_v30 = vsel %vm1284_vm6, %v965_v10, %v1412_v19 }
  0xe4   :  { %v2802_v28 = vpack.c.bf16 %v1543_v25, %v1542_v23  ;;  %v2637_v31 = vpack.c.bf16 %v1477_v29, %v1476_v27  ;;  %v1541_v32 = vsel %vm1285_vm10, %v968_v17, %v1413_v26 }
  0xe5   :  { %2954 = vst [vmem:[%s3821_s2 + $0x8] sm:$0xff] %v2642_v24   ;;  %v3093_v33 = vpop.f32.mrb[4].mxu0  ;;  %v3157_v34 = vpop.f32.mrb[4].mxu1  ;;  %v2797_v35 = vpack.c.bf16 %v1541_v32, %v1540_v30 }
  0xe6   :  { %2986 = vst [vmem:[%s3821_s2 + $0x108] sm:$0xff] %v2802_v28   ;;  %vm1226_vm11 = vcmp.ge.f32.partialorder %v3093_v33, 0.0  ;;  %v1354_v36 = vmul.f32 0.25, %v3093_v33  ;;  %v725_v37 = vpop.f32.mrb[5].mxu0  ;;  %v981_v38 = vpop.f32.mrb[5].mxu1  ;;  %2638 = vst [vmem:[%s3821_s2] sm:$0xff] %v2637_v31   ;;  %vm1290_vm12 = vcmp.ge.f32.partialorder %v3157_v34, 0.0 }
  0xe7   :  { %v1418_v39 = vmul.f32 0.25, %v3157_v34  ;;  %vm1224_vm13 = vcmp.ge.f32.partialorder %v725_v37, 0.0  ;;  %v3094_v40 = vpop.f32.mrb[6].mxu0  ;;  %v3158_v41 = vpop.f32.mrb[6].mxu1  ;;  %2985 = vst [vmem:[%s3821_s2 + $0x100] sm:$0xff] %v2797_v35   ;;  %v1352_v42 = vmul.f32 0.25, %v725_v37 }
  0xe8   :  { %vm1288_vm14 = vcmp.ge.f32.partialorder %v981_v38, 0.0  ;;  %vm1227_vm15 = vcmp.ge.f32.partialorder %v3094_v40, 0.0  ;;  %v1355_v43 = vmul.f32 0.25, %v3094_v40  ;;  %v728_v44 = vpop.f32.mrb[7].mxu0  ;;  %v984_v45 = vpop.f32.mrb[7].mxu1  ;;  %v1482_v46 = vsel %vm1226_vm11, %v3093_v33, %v1354_v36 }
  0xe9   :  { %v1416_v47 = vmul.f32 0.25, %v981_v38  ;;  %vm1291_vm0 = vcmp.ge.f32.partialorder %v3158_v41, 0.0  ;;  %v1419_v48 = vmul.f32 0.25, %v3158_v41  ;;  %v1546_v49 = vsel %vm1290_vm12, %v3157_v34, %v1418_v39 }
  0xea   :  { %v1483_v50 = vsel %vm1227_vm15, %v3094_v40, %v1355_v43  ;;  %vm1225_vm1 = vcmp.ge.f32.partialorder %v728_v44, 0.0  ;;  %v1353_v51 = vmul.f32 0.25, %v728_v44  ;;  %vm1289_vm2 = vcmp.ge.f32.partialorder %v984_v45, 0.0 }
  0xeb   :  { %v2652_v52 = vpack.c.bf16 %v1483_v50, %v1482_v46  ;;  %v1547_v53 = vsel %vm1291_vm0, %v3158_v41, %v1419_v48  ;;  %v1417_v54 = vmul.f32 0.25, %v984_v45  ;;  %v1480_v55 = vsel %vm1224_vm13, %v725_v37, %v1352_v42 }
  0xec   :  { %v2812_v56 = vpack.c.bf16 %v1547_v53, %v1546_v49  ;;  %v1481_v57 = vsel %vm1225_vm1, %v728_v44, %v1353_v51  ;;  %v1544_v58 = vsel %vm1288_vm14, %v981_v38, %v1416_v47 }
  0xed   :  { %2956 = vst [vmem:[%s3821_s2 + $0x18] sm:$0xff] %v2652_v52   ;;  %v2647_v59 = vpack.c.bf16 %v1481_v57, %v1480_v55  ;;  %v1545_v60 = vsel %vm1289_vm2, %v984_v45, %v1417_v54  ;;  %v3097_v61 = vpop.f32.mrb[8].mxu0  ;;  %v3161_v62 = vpop.f32.mrb[8].mxu1 }
  0xee   :  { %2988 = vst [vmem:[%s3821_s2 + $0x118] sm:$0xff] %v2812_v56   ;;  %v2807_v63 = vpack.c.bf16 %v1545_v60, %v1544_v58  ;;  %vm1230_vm3 = vcmp.ge.f32.partialorder %v3097_v61, 0.0  ;;  %v1358_v0 = vmul.f32 0.25, %v3097_v61  ;;  %v741_v1 = vpop.f32.mrb[9].mxu0  ;;  %v997_v2 = vpop.f32.mrb[9].mxu1  ;;  %vm1294_vm4 = vcmp.ge.f32.partialorder %v3161_v62, 0.0 }
  0xef   :  { %2955 = vst [vmem:[%s3821_s2 + $0x10] sm:$0xff] %v2647_v59   ;;  %v1422_v3 = vmul.f32 0.25, %v3161_v62  ;;  %vm1228_vm5 = vcmp.ge.f32.partialorder %v741_v1, 0.0  ;;  %v3098_v4 = vpop.f32.mrb[10].mxu0  ;;  %v3162_v5 = vpop.f32.mrb[10].mxu1  ;;  %v1356_v6 = vmul.f32 0.25, %v741_v1 }
  0xf0   :  { %2987 = vst [vmem:[%s3821_s2 + $0x110] sm:$0xff] %v2807_v63   ;;  %vm1292_vm6 = vcmp.ge.f32.partialorder %v997_v2, 0.0  ;;  %vm1231_vm7 = vcmp.ge.f32.partialorder %v3098_v4, 0.0  ;;  %v1359_v7 = vmul.f32 0.25, %v3098_v4  ;;  %v744_v8 = vpop.f32.mrb[11].mxu0  ;;  %v1000_v9 = vpop.f32.mrb[11].mxu1  ;;  %v1486_v10 = vsel %vm1230_vm3, %v3097_v61, %v1358_v0 }
  0xf1   :  { %v1420_v11 = vmul.f32 0.25, %v997_v2  ;;  %vm1295_vm8 = vcmp.ge.f32.partialorder %v3162_v5, 0.0  ;;  %v1423_v12 = vmul.f32 0.25, %v3162_v5  ;;  %v1550_v13 = vsel %vm1294_vm4, %v3161_v62, %v1422_v3 }
  0xf2   :  { %v1487_v14 = vsel %vm1231_vm7, %v3098_v4, %v1359_v7  ;;  %vm1229_vm9 = vcmp.ge.f32.partialorder %v744_v8, 0.0  ;;  %v1357_v15 = vmul.f32 0.25, %v744_v8  ;;  %vm1293_vm10 = vcmp.ge.f32.partialorder %v1000_v9, 0.0 }
  0xf3   :  { %v2662_v16 = vpack.c.bf16 %v1487_v14, %v1486_v10  ;;  %v1551_v17 = vsel %vm1295_vm8, %v3162_v5, %v1423_v12  ;;  %v1421_v18 = vmul.f32 0.25, %v1000_v9  ;;  %v1484_v19 = vsel %vm1228_vm5, %v741_v1, %v1356_v6 }
  0xf4   :  { %v2822_v20 = vpack.c.bf16 %v1551_v17, %v1550_v13  ;;  %v1485_v21 = vsel %vm1229_vm9, %v744_v8, %v1357_v15  ;;  %v1548_v22 = vsel %vm1292_vm6, %v997_v2, %v1420_v11 }
  0xf5   :  { %2958 = vst [vmem:[%s3821_s2 + $0x28] sm:$0xff] %v2662_v16   ;;  %v2657_v23 = vpack.c.bf16 %v1485_v21, %v1484_v19  ;;  %v1549_v24 = vsel %vm1293_vm10, %v1000_v9, %v1421_v18  ;;  %v3101_v25 = vpop.f32.mrb[12].mxu0  ;;  %v3165_v26 = vpop.f32.mrb[12].mxu1 }
  0xf6   :  { %2990 = vst [vmem:[%s3821_s2 + $0x128] sm:$0xff] %v2822_v20   ;;  %v2817_v27 = vpack.c.bf16 %v1549_v24, %v1548_v22  ;;  %vm1234_vm11 = vcmp.ge.f32.partialorder %v3101_v25, 0.0  ;;  %v1362_v28 = vmul.f32 0.25, %v3101_v25  ;;  %v757_v29 = vpop.f32.mrb[13].mxu0  ;;  %v1013_v30 = vpop.f32.mrb[13].mxu1  ;;  %vm1298_vm12 = vcmp.ge.f32.partialorder %v3165_v26, 0.0 }
  0xf7   :  { %2957 = vst [vmem:[%s3821_s2 + $0x20] sm:$0xff] %v2657_v23   ;;  %v1426_v31 = vmul.f32 0.25, %v3165_v26  ;;  %vm1232_vm13 = vcmp.ge.f32.partialorder %v757_v29, 0.0  ;;  %v3102_v32 = vpop.f32.mrb[14].mxu0  ;;  %v3166_v33 = vpop.f32.mrb[14].mxu1  ;;  %v1360_v34 = vmul.f32 0.25, %v757_v29 }
  0xf8   :  { %2989 = vst [vmem:[%s3821_s2 + $0x120] sm:$0xff] %v2817_v27   ;;  %vm1296_vm14 = vcmp.ge.f32.partialorder %v1013_v30, 0.0  ;;  %vm1235_vm15 = vcmp.ge.f32.partialorder %v3102_v32, 0.0  ;;  %v1363_v35 = vmul.f32 0.25, %v3102_v32  ;;  %v760_v36 = vpop.f32.mrb[15].mxu0  ;;  %v1016_v37 = vpop.f32.mrb[15].mxu1  ;;  %v1490_v38 = vsel %vm1234_vm11, %v3101_v25, %v1362_v28 }
  0xf9   :  { %v1424_v39 = vmul.f32 0.25, %v1013_v30  ;;  %vm1299_vm0 = vcmp.ge.f32.partialorder %v3166_v33, 0.0  ;;  %v1427_v40 = vmul.f32 0.25, %v3166_v33  ;;  %v1554_v41 = vsel %vm1298_vm12, %v3165_v26, %v1426_v31 }
  0xfa   :  { %v1491_v42 = vsel %vm1235_vm15, %v3102_v32, %v1363_v35  ;;  %vm1233_vm1 = vcmp.ge.f32.partialorder %v760_v36, 0.0  ;;  %v1361_v43 = vmul.f32 0.25, %v760_v36  ;;  %vm1297_vm2 = vcmp.ge.f32.partialorder %v1016_v37, 0.0 }
  0xfb   :  { %v2672_v44 = vpack.c.bf16 %v1491_v42, %v1490_v38  ;;  %v1555_v45 = vsel %vm1299_vm0, %v3166_v33, %v1427_v40  ;;  %v1425_v46 = vmul.f32 0.25, %v1016_v37  ;;  %v1488_v47 = vsel %vm1232_vm13, %v757_v29, %v1360_v34 }
  0xfc   :  { %v2832_v48 = vpack.c.bf16 %v1555_v45, %v1554_v41  ;;  %v1489_v49 = vsel %vm1233_vm1, %v760_v36, %v1361_v43  ;;  %v1552_v50 = vsel %vm1296_vm14, %v1013_v30, %v1424_v39 }
  0xfd   :  { %2960 = vst [vmem:[%s3821_s2 + $0x38] sm:$0xff] %v2672_v44   ;;  %v2667_v51 = vpack.c.bf16 %v1489_v49, %v1488_v47  ;;  %v1553_v52 = vsel %vm1297_vm2, %v1016_v37, %v1425_v46  ;;  %v3105_v53 = vpop.f32.mrb[16].mxu0  ;;  %v3169_v54 = vpop.f32.mrb[16].mxu1 }
  0xfe   :  { %2992 = vst [vmem:[%s3821_s2 + $0x138] sm:$0xff] %v2832_v48   ;;  %v2827_v55 = vpack.c.bf16 %v1553_v52, %v1552_v50  ;;  %vm1238_vm3 = vcmp.ge.f32.partialorder %v3105_v53, 0.0  ;;  %v1366_v56 = vmul.f32 0.25, %v3105_v53  ;;  %v773_v57 = vpop.f32.mrb[17].mxu0  ;;  %v1029_v58 = vpop.f32.mrb[17].mxu1  ;;  %vm1302_vm4 = vcmp.ge.f32.partialorder %v3169_v54, 0.0 }
  0xff   :  { %2959 = vst [vmem:[%s3821_s2 + $0x30] sm:$0xff] %v2667_v51   ;;  %v1430_v59 = vmul.f32 0.25, %v3169_v54  ;;  %vm1236_vm5 = vcmp.ge.f32.partialorder %v773_v57, 0.0  ;;  %v3106_v60 = vpop.f32.mrb[18].mxu0  ;;  %v3170_v61 = vpop.f32.mrb[18].mxu1  ;;  %v1364_v62 = vmul.f32 0.25, %v773_v57 }
 0x100   :  { %2991 = vst [vmem:[%s3821_s2 + $0x130] sm:$0xff] %v2827_v55   ;;  %vm1300_vm6 = vcmp.ge.f32.partialorder %v1029_v58, 0.0  ;;  %vm1239_vm7 = vcmp.ge.f32.partialorder %v3106_v60, 0.0  ;;  %v1367_v63 = vmul.f32 0.25, %v3106_v60  ;;  %v776_v0 = vpop.f32.mrb[19].mxu0  ;;  %v1032_v1 = vpop.f32.mrb[19].mxu1  ;;  %v1494_v2 = vsel %vm1238_vm3, %v3105_v53, %v1366_v56 }
 0x101   :  { %v1428_v3 = vmul.f32 0.25, %v1029_v58  ;;  %vm1303_vm8 = vcmp.ge.f32.partialorder %v3170_v61, 0.0  ;;  %v1431_v4 = vmul.f32 0.25, %v3170_v61  ;;  %v1558_v5 = vsel %vm1302_vm4, %v3169_v54, %v1430_v59 }
 0x102   :  { %v1495_v6 = vsel %vm1239_vm7, %v3106_v60, %v1367_v63  ;;  %vm1237_vm9 = vcmp.ge.f32.partialorder %v776_v0, 0.0  ;;  %v1365_v7 = vmul.f32 0.25, %v776_v0  ;;  %vm1301_vm10 = vcmp.ge.f32.partialorder %v1032_v1, 0.0 }
 0x103   :  { %v2682_v8 = vpack.c.bf16 %v1495_v6, %v1494_v2  ;;  %v1559_v9 = vsel %vm1303_vm8, %v3170_v61, %v1431_v4  ;;  %v1429_v10 = vmul.f32 0.25, %v1032_v1  ;;  %v1492_v11 = vsel %vm1236_vm5, %v773_v57, %v1364_v62 }
 0x104   :  { %v2842_v12 = vpack.c.bf16 %v1559_v9, %v1558_v5  ;;  %v1493_v13 = vsel %vm1237_vm9, %v776_v0, %v1365_v7  ;;  %v1556_v14 = vsel %vm1300_vm6, %v1029_v58, %v1428_v3 }
 0x105   :  { %2962 = vst [vmem:[%s3821_s2 + $0x48] sm:$0xff] %v2682_v8   ;;  %v2677_v15 = vpack.c.bf16 %v1493_v13, %v1492_v11  ;;  %v1557_v16 = vsel %vm1301_vm10, %v1032_v1, %v1429_v10  ;;  %v3109_v17 = vpop.f32.mrb[20].mxu0  ;;  %v3173_v18 = vpop.f32.mrb[20].mxu1 }
 0x106   :  { %2994 = vst [vmem:[%s3821_s2 + $0x148] sm:$0xff] %v2842_v12   ;;  %v2837_v19 = vpack.c.bf16 %v1557_v16, %v1556_v14  ;;  %vm1242_vm11 = vcmp.ge.f32.partialorder %v3109_v17, 0.0  ;;  %v1370_v20 = vmul.f32 0.25, %v3109_v17  ;;  %v789_v21 = vpop.f32.mrb[21].mxu0  ;;  %v1045_v22 = vpop.f32.mrb[21].mxu1  ;;  %vm1306_vm12 = vcmp.ge.f32.partialorder %v3173_v18, 0.0 }
 0x107   :  { %2961 = vst [vmem:[%s3821_s2 + $0x40] sm:$0xff] %v2677_v15   ;;  %v1434_v23 = vmul.f32 0.25, %v3173_v18  ;;  %vm1240_vm13 = vcmp.ge.f32.partialorder %v789_v21, 0.0  ;;  %v3110_v24 = vpop.f32.mrb[22].mxu0  ;;  %v3174_v25 = vpop.f32.mrb[22].mxu1  ;;  %v1368_v26 = vmul.f32 0.25, %v789_v21 }
 0x108   :  { %2993 = vst [vmem:[%s3821_s2 + $0x140] sm:$0xff] %v2837_v19   ;;  %vm1304_vm14 = vcmp.ge.f32.partialorder %v1045_v22, 0.0  ;;  %vm1243_vm15 = vcmp.ge.f32.partialorder %v3110_v24, 0.0  ;;  %v1371_v27 = vmul.f32 0.25, %v3110_v24  ;;  %v792_v28 = vpop.f32.mrb[23].mxu0  ;;  %v1048_v29 = vpop.f32.mrb[23].mxu1  ;;  %v1498_v30 = vsel %vm1242_vm11, %v3109_v17, %v1370_v20 }
 0x109   :  { %v1432_v31 = vmul.f32 0.25, %v1045_v22  ;;  %vm1307_vm0 = vcmp.ge.f32.partialorder %v3174_v25, 0.0  ;;  %v1435_v32 = vmul.f32 0.25, %v3174_v25  ;;  %v1562_v33 = vsel %vm1306_vm12, %v3173_v18, %v1434_v23 }
 0x10a   :  { %v1499_v34 = vsel %vm1243_vm15, %v3110_v24, %v1371_v27  ;;  %vm1241_vm1 = vcmp.ge.f32.partialorder %v792_v28, 0.0  ;;  %v1369_v35 = vmul.f32 0.25, %v792_v28  ;;  %vm1305_vm2 = vcmp.ge.f32.partialorder %v1048_v29, 0.0 }
 0x10b   :  { %v2692_v36 = vpack.c.bf16 %v1499_v34, %v1498_v30  ;;  %v1563_v37 = vsel %vm1307_vm0, %v3174_v25, %v1435_v32  ;;  %v1433_v38 = vmul.f32 0.25, %v1048_v29  ;;  %v1496_v39 = vsel %vm1240_vm13, %v789_v21, %v1368_v26 }
 0x10c   :  { %v2852_v40 = vpack.c.bf16 %v1563_v37, %v1562_v33  ;;  %v1497_v41 = vsel %vm1241_vm1, %v792_v28, %v1369_v35  ;;  %v1560_v42 = vsel %vm1304_vm14, %v1045_v22, %v1432_v31 }
 0x10d   :  { %2964 = vst [vmem:[%s3821_s2 + $0x58] sm:$0xff] %v2692_v36   ;;  %v2687_v43 = vpack.c.bf16 %v1497_v41, %v1496_v39  ;;  %v1561_v44 = vsel %vm1305_vm2, %v1048_v29, %v1433_v38  ;;  %v3113_v45 = vpop.f32.mrb[24].mxu0  ;;  %v3177_v46 = vpop.f32.mrb[24].mxu1 }
 0x10e   :  { %2996 = vst [vmem:[%s3821_s2 + $0x158] sm:$0xff] %v2852_v40   ;;  %v2847_v47 = vpack.c.bf16 %v1561_v44, %v1560_v42  ;;  %vm1246_vm3 = vcmp.ge.f32.partialorder %v3113_v45, 0.0  ;;  %v1374_v48 = vmul.f32 0.25, %v3113_v45  ;;  %v805_v49 = vpop.f32.mrb[25].mxu0  ;;  %v1061_v50 = vpop.f32.mrb[25].mxu1  ;;  %vm1310_vm4 = vcmp.ge.f32.partialorder %v3177_v46, 0.0 }
 0x10f   :  { %2963 = vst [vmem:[%s3821_s2 + $0x50] sm:$0xff] %v2687_v43   ;;  %v1438_v51 = vmul.f32 0.25, %v3177_v46  ;;  %vm1244_vm5 = vcmp.ge.f32.partialorder %v805_v49, 0.0  ;;  %v3114_v52 = vpop.f32.mrb[26].mxu0  ;;  %v3178_v53 = vpop.f32.mrb[26].mxu1  ;;  %v1372_v54 = vmul.f32 0.25, %v805_v49 }
 0x110   :  { %2995 = vst [vmem:[%s3821_s2 + $0x150] sm:$0xff] %v2847_v47   ;;  %vm1308_vm6 = vcmp.ge.f32.partialorder %v1061_v50, 0.0  ;;  %vm1247_vm7 = vcmp.ge.f32.partialorder %v3114_v52, 0.0  ;;  %v1375_v55 = vmul.f32 0.25, %v3114_v52  ;;  %v808_v56 = vpop.f32.mrb[27].mxu0  ;;  %v1064_v57 = vpop.f32.mrb[27].mxu1  ;;  %v1502_v58 = vsel %vm1246_vm3, %v3113_v45, %v1374_v48 }
 0x111   :  { %v1436_v59 = vmul.f32 0.25, %v1061_v50  ;;  %vm1311_vm8 = vcmp.ge.f32.partialorder %v3178_v53, 0.0  ;;  %v1439_v60 = vmul.f32 0.25, %v3178_v53  ;;  %v1566_v61 = vsel %vm1310_vm4, %v3177_v46, %v1438_v51 }
 0x112   :  { %v1503_v62 = vsel %vm1247_vm7, %v3114_v52, %v1375_v55  ;;  %vm1245_vm9 = vcmp.ge.f32.partialorder %v808_v56, 0.0  ;;  %v1373_v63 = vmul.f32 0.25, %v808_v56  ;;  %vm1309_vm10 = vcmp.ge.f32.partialorder %v1064_v57, 0.0 }
 0x113   :  { %v2702_v0 = vpack.c.bf16 %v1503_v62, %v1502_v58  ;;  %v1567_v1 = vsel %vm1311_vm8, %v3178_v53, %v1439_v60  ;;  %v1437_v2 = vmul.f32 0.25, %v1064_v57  ;;  %v1500_v3 = vsel %vm1244_vm5, %v805_v49, %v1372_v54 }
 0x114   :  { %v2862_v4 = vpack.c.bf16 %v1567_v1, %v1566_v61  ;;  %v1501_v5 = vsel %vm1245_vm9, %v808_v56, %v1373_v63  ;;  %v1564_v6 = vsel %vm1308_vm6, %v1061_v50, %v1436_v59 }
 0x115   :  { %2966 = vst [vmem:[%s3821_s2 + $0x68] sm:$0xff] %v2702_v0   ;;  %v2697_v7 = vpack.c.bf16 %v1501_v5, %v1500_v3  ;;  %v1565_v8 = vsel %vm1309_vm10, %v1064_v57, %v1437_v2  ;;  %v3117_v9 = vpop.f32.mrb[28].mxu0  ;;  %v3181_v10 = vpop.f32.mrb[28].mxu1 }
 0x116   :  { %2998 = vst [vmem:[%s3821_s2 + $0x168] sm:$0xff] %v2862_v4   ;;  %v2857_v11 = vpack.c.bf16 %v1565_v8, %v1564_v6  ;;  %vm1250_vm11 = vcmp.ge.f32.partialorder %v3117_v9, 0.0  ;;  %v1378_v12 = vmul.f32 0.25, %v3117_v9  ;;  %v821_v13 = vpop.f32.mrb[29].mxu0  ;;  %v1077_v14 = vpop.f32.mrb[29].mxu1  ;;  %vm1314_vm12 = vcmp.ge.f32.partialorder %v3181_v10, 0.0 }
 0x117   :  { %2965 = vst [vmem:[%s3821_s2 + $0x60] sm:$0xff] %v2697_v7   ;;  %v1442_v15 = vmul.f32 0.25, %v3181_v10  ;;  %vm1248_vm13 = vcmp.ge.f32.partialorder %v821_v13, 0.0  ;;  %v3118_v16 = vpop.f32.mrb[30].mxu0  ;;  %v3182_v17 = vpop.f32.mrb[30].mxu1  ;;  %v1376_v18 = vmul.f32 0.25, %v821_v13 }
 0x118   :  { %2997 = vst [vmem:[%s3821_s2 + $0x160] sm:$0xff] %v2857_v11   ;;  %vm1312_vm14 = vcmp.ge.f32.partialorder %v1077_v14, 0.0  ;;  %vm1251_vm15 = vcmp.ge.f32.partialorder %v3118_v16, 0.0  ;;  %v1379_v19 = vmul.f32 0.25, %v3118_v16  ;;  %v824_v20 = vpop.f32.mrb[31].mxu0  ;;  %v1080_v21 = vpop.f32.mrb[31].mxu1  ;;  %v1506_v22 = vsel %vm1250_vm11, %v3117_v9, %v1378_v12 }
 0x119   :  { %v1440_v23 = vmul.f32 0.25, %v1077_v14  ;;  %vm1315_vm0 = vcmp.ge.f32.partialorder %v3182_v17, 0.0  ;;  %v1443_v24 = vmul.f32 0.25, %v3182_v17  ;;  %v1570_v25 = vsel %vm1314_vm12, %v3181_v10, %v1442_v15 }
 0x11a   :  { %v1507_v26 = vsel %vm1251_vm15, %v3118_v16, %v1379_v19  ;;  %vm1249_vm1 = vcmp.ge.f32.partialorder %v824_v20, 0.0  ;;  %v1377_v27 = vmul.f32 0.25, %v824_v20  ;;  %vm1313_vm2 = vcmp.ge.f32.partialorder %v1080_v21, 0.0 }
 0x11b   :  { %v2712_v28 = vpack.c.bf16 %v1507_v26, %v1506_v22  ;;  %v1571_v29 = vsel %vm1315_vm0, %v3182_v17, %v1443_v24  ;;  %v1441_v30 = vmul.f32 0.25, %v1080_v21  ;;  %v1504_v31 = vsel %vm1248_vm13, %v821_v13, %v1376_v18 }
 0x11c   :  { %v2872_v32 = vpack.c.bf16 %v1571_v29, %v1570_v25  ;;  %v1505_v33 = vsel %vm1249_vm1, %v824_v20, %v1377_v27  ;;  %v1568_v34 = vsel %vm1312_vm14, %v1077_v14, %v1440_v23 }
 0x11d   :  { %2968 = vst [vmem:[%s3821_s2 + $0x78] sm:$0xff] %v2712_v28   ;;  %v2707_v35 = vpack.c.bf16 %v1505_v33, %v1504_v31  ;;  %v1569_v36 = vsel %vm1313_vm2, %v1080_v21, %v1441_v30  ;;  %v3121_v37 = vpop.f32.mrb[32].mxu0  ;;  %v3185_v38 = vpop.f32.mrb[32].mxu1 }
 0x11e   :  { %3000 = vst [vmem:[%s3821_s2 + $0x178] sm:$0xff] %v2872_v32   ;;  %v2867_v39 = vpack.c.bf16 %v1569_v36, %v1568_v34  ;;  %vm1254_vm3 = vcmp.ge.f32.partialorder %v3121_v37, 0.0  ;;  %v1382_v40 = vmul.f32 0.25, %v3121_v37  ;;  %v837_v41 = vpop.f32.mrb[33].mxu0  ;;  %v1093_v42 = vpop.f32.mrb[33].mxu1  ;;  %vm1318_vm4 = vcmp.ge.f32.partialorder %v3185_v38, 0.0 }
 0x11f   :  { %2967 = vst [vmem:[%s3821_s2 + $0x70] sm:$0xff] %v2707_v35   ;;  %v1446_v43 = vmul.f32 0.25, %v3185_v38  ;;  %vm1252_vm5 = vcmp.ge.f32.partialorder %v837_v41, 0.0  ;;  %v3122_v44 = vpop.f32.mrb[34].mxu0  ;;  %v3186_v45 = vpop.f32.mrb[34].mxu1  ;;  %v1380_v46 = vmul.f32 0.25, %v837_v41 }
 0x120   :  { %2999 = vst [vmem:[%s3821_s2 + $0x170] sm:$0xff] %v2867_v39   ;;  %vm1316_vm6 = vcmp.ge.f32.partialorder %v1093_v42, 0.0  ;;  %vm1255_vm7 = vcmp.ge.f32.partialorder %v3122_v44, 0.0  ;;  %v1383_v47 = vmul.f32 0.25, %v3122_v44  ;;  %v840_v48 = vpop.f32.mrb[35].mxu0  ;;  %v1096_v49 = vpop.f32.mrb[35].mxu1  ;;  %v1510_v50 = vsel %vm1254_vm3, %v3121_v37, %v1382_v40 }
 0x121   :  { %v1444_v51 = vmul.f32 0.25, %v1093_v42  ;;  %vm1319_vm8 = vcmp.ge.f32.partialorder %v3186_v45, 0.0  ;;  %v1447_v52 = vmul.f32 0.25, %v3186_v45  ;;  %v1574_v53 = vsel %vm1318_vm4, %v3185_v38, %v1446_v43 }
 0x122   :  { %v1511_v54 = vsel %vm1255_vm7, %v3122_v44, %v1383_v47  ;;  %vm1253_vm9 = vcmp.ge.f32.partialorder %v840_v48, 0.0  ;;  %v1381_v55 = vmul.f32 0.25, %v840_v48  ;;  %vm1317_vm10 = vcmp.ge.f32.partialorder %v1096_v49, 0.0 }
 0x123   :  { %v2722_v56 = vpack.c.bf16 %v1511_v54, %v1510_v50  ;;  %v1575_v57 = vsel %vm1319_vm8, %v3186_v45, %v1447_v52  ;;  %v1445_v58 = vmul.f32 0.25, %v1096_v49  ;;  %v1508_v59 = vsel %vm1252_vm5, %v837_v41, %v1380_v46 }
 0x124   :  { %v2882_v60 = vpack.c.bf16 %v1575_v57, %v1574_v53  ;;  %v1509_v61 = vsel %vm1253_vm9, %v840_v48, %v1381_v55  ;;  %v1572_v62 = vsel %vm1316_vm6, %v1093_v42, %v1444_v51 }
 0x125   :  { %2970 = vst [vmem:[%s3821_s2 + $0x88] sm:$0xff] %v2722_v56   ;;  %v2717_v63 = vpack.c.bf16 %v1509_v61, %v1508_v59  ;;  %v1573_v0 = vsel %vm1317_vm10, %v1096_v49, %v1445_v58  ;;  %v3125_v1 = vpop.f32.mrb[36].mxu0  ;;  %v3189_v2 = vpop.f32.mrb[36].mxu1 }
 0x126   :  { %3002 = vst [vmem:[%s3821_s2 + $0x188] sm:$0xff] %v2882_v60   ;;  %v2877_v3 = vpack.c.bf16 %v1573_v0, %v1572_v62  ;;  %vm1258_vm11 = vcmp.ge.f32.partialorder %v3125_v1, 0.0  ;;  %v1386_v4 = vmul.f32 0.25, %v3125_v1  ;;  %v853_v5 = vpop.f32.mrb[37].mxu0  ;;  %v1109_v6 = vpop.f32.mrb[37].mxu1  ;;  %vm1322_vm12 = vcmp.ge.f32.partialorder %v3189_v2, 0.0 }
 0x127   :  { %2969 = vst [vmem:[%s3821_s2 + $0x80] sm:$0xff] %v2717_v63   ;;  %v1450_v7 = vmul.f32 0.25, %v3189_v2  ;;  %vm1256_vm13 = vcmp.ge.f32.partialorder %v853_v5, 0.0  ;;  %v3126_v8 = vpop.f32.mrb[38].mxu0  ;;  %v3190_v9 = vpop.f32.mrb[38].mxu1  ;;  %v1384_v10 = vmul.f32 0.25, %v853_v5 }
 0x128   :  { %3001 = vst [vmem:[%s3821_s2 + $0x180] sm:$0xff] %v2877_v3   ;;  %vm1320_vm14 = vcmp.ge.f32.partialorder %v1109_v6, 0.0  ;;  %vm1259_vm15 = vcmp.ge.f32.partialorder %v3126_v8, 0.0  ;;  %v1387_v11 = vmul.f32 0.25, %v3126_v8  ;;  %v856_v12 = vpop.f32.mrb[39].mxu0  ;;  %v1112_v13 = vpop.f32.mrb[39].mxu1  ;;  %v1514_v14 = vsel %vm1258_vm11, %v3125_v1, %v1386_v4 }
 0x129   :  { %v1448_v15 = vmul.f32 0.25, %v1109_v6  ;;  %vm1323_vm0 = vcmp.ge.f32.partialorder %v3190_v9, 0.0  ;;  %v1451_v16 = vmul.f32 0.25, %v3190_v9  ;;  %v1578_v17 = vsel %vm1322_vm12, %v3189_v2, %v1450_v7 }
 0x12a   :  { %v1515_v18 = vsel %vm1259_vm15, %v3126_v8, %v1387_v11  ;;  %vm1257_vm1 = vcmp.ge.f32.partialorder %v856_v12, 0.0  ;;  %v1385_v19 = vmul.f32 0.25, %v856_v12  ;;  %vm1321_vm2 = vcmp.ge.f32.partialorder %v1112_v13, 0.0 }
 0x12b   :  { %v2732_v20 = vpack.c.bf16 %v1515_v18, %v1514_v14  ;;  %v1579_v21 = vsel %vm1323_vm0, %v3190_v9, %v1451_v16  ;;  %v1449_v22 = vmul.f32 0.25, %v1112_v13  ;;  %v1512_v23 = vsel %vm1256_vm13, %v853_v5, %v1384_v10 }
 0x12c   :  { %v2892_v24 = vpack.c.bf16 %v1579_v21, %v1578_v17  ;;  %v1513_v25 = vsel %vm1257_vm1, %v856_v12, %v1385_v19  ;;  %v1576_v26 = vsel %vm1320_vm14, %v1109_v6, %v1448_v15 }
 0x12d   :  { %2972 = vst [vmem:[%s3821_s2 + $0x98] sm:$0xff] %v2732_v20   ;;  %v2727_v27 = vpack.c.bf16 %v1513_v25, %v1512_v23  ;;  %v1577_v28 = vsel %vm1321_vm2, %v1112_v13, %v1449_v22  ;;  %v3129_v29 = vpop.f32.mrb[40].mxu0  ;;  %v3193_v30 = vpop.f32.mrb[40].mxu1 }
 0x12e   :  { %3004 = vst [vmem:[%s3821_s2 + $0x198] sm:$0xff] %v2892_v24   ;;  %v2887_v31 = vpack.c.bf16 %v1577_v28, %v1576_v26  ;;  %vm1262_vm3 = vcmp.ge.f32.partialorder %v3129_v29, 0.0  ;;  %v1390_v32 = vmul.f32 0.25, %v3129_v29  ;;  %v869_v33 = vpop.f32.mrb[41].mxu0  ;;  %v1125_v34 = vpop.f32.mrb[41].mxu1  ;;  %vm1326_vm4 = vcmp.ge.f32.partialorder %v3193_v30, 0.0 }
 0x12f   :  { %2971 = vst [vmem:[%s3821_s2 + $0x90] sm:$0xff] %v2727_v27   ;;  %v1454_v35 = vmul.f32 0.25, %v3193_v30  ;;  %vm1260_vm5 = vcmp.ge.f32.partialorder %v869_v33, 0.0  ;;  %v3130_v36 = vpop.f32.mrb[42].mxu0  ;;  %v3194_v37 = vpop.f32.mrb[42].mxu1  ;;  %v1388_v38 = vmul.f32 0.25, %v869_v33 }
 0x130   :  { %3003 = vst [vmem:[%s3821_s2 + $0x190] sm:$0xff] %v2887_v31   ;;  %vm1324_vm6 = vcmp.ge.f32.partialorder %v1125_v34, 0.0  ;;  %vm1263_vm7 = vcmp.ge.f32.partialorder %v3130_v36, 0.0  ;;  %v1391_v39 = vmul.f32 0.25, %v3130_v36  ;;  %v872_v40 = vpop.f32.mrb[43].mxu0  ;;  %v1128_v41 = vpop.f32.mrb[43].mxu1  ;;  %v1518_v42 = vsel %vm1262_vm3, %v3129_v29, %v1390_v32 }
 0x131   :  { %v1452_v43 = vmul.f32 0.25, %v1125_v34  ;;  %vm1327_vm8 = vcmp.ge.f32.partialorder %v3194_v37, 0.0  ;;  %v1455_v44 = vmul.f32 0.25, %v3194_v37  ;;  %v1582_v45 = vsel %vm1326_vm4, %v3193_v30, %v1454_v35 }
 0x132   :  { %v1519_v46 = vsel %vm1263_vm7, %v3130_v36, %v1391_v39  ;;  %vm1261_vm9 = vcmp.ge.f32.partialorder %v872_v40, 0.0  ;;  %v1389_v47 = vmul.f32 0.25, %v872_v40  ;;  %vm1325_vm10 = vcmp.ge.f32.partialorder %v1128_v41, 0.0 }
 0x133   :  { %v2742_v48 = vpack.c.bf16 %v1519_v46, %v1518_v42  ;;  %v1583_v49 = vsel %vm1327_vm8, %v3194_v37, %v1455_v44  ;;  %v1453_v50 = vmul.f32 0.25, %v1128_v41  ;;  %v1516_v51 = vsel %vm1260_vm5, %v869_v33, %v1388_v38 }
 0x134   :  { %v2902_v52 = vpack.c.bf16 %v1583_v49, %v1582_v45  ;;  %v1517_v53 = vsel %vm1261_vm9, %v872_v40, %v1389_v47  ;;  %v1580_v54 = vsel %vm1324_vm6, %v1125_v34, %v1452_v43 }
 0x135   :  { %2974 = vst [vmem:[%s3821_s2 + $0xa8] sm:$0xff] %v2742_v48   ;;  %v2737_v55 = vpack.c.bf16 %v1517_v53, %v1516_v51  ;;  %v1581_v56 = vsel %vm1325_vm10, %v1128_v41, %v1453_v50  ;;  %v3133_v57 = vpop.f32.mrb[44].mxu0  ;;  %v3197_v58 = vpop.f32.mrb[44].mxu1 }
 0x136   :  { %3006 = vst [vmem:[%s3821_s2 + $0x1a8] sm:$0xff] %v2902_v52   ;;  %v2897_v59 = vpack.c.bf16 %v1581_v56, %v1580_v54  ;;  %vm1266_vm11 = vcmp.ge.f32.partialorder %v3133_v57, 0.0  ;;  %v1394_v60 = vmul.f32 0.25, %v3133_v57  ;;  %v885_v61 = vpop.f32.mrb[45].mxu0  ;;  %v1141_v62 = vpop.f32.mrb[45].mxu1  ;;  %vm1330_vm12 = vcmp.ge.f32.partialorder %v3197_v58, 0.0 }
 0x137   :  { %2973 = vst [vmem:[%s3821_s2 + $0xa0] sm:$0xff] %v2737_v55   ;;  %v1458_v63 = vmul.f32 0.25, %v3197_v58  ;;  %vm1264_vm13 = vcmp.ge.f32.partialorder %v885_v61, 0.0  ;;  %v3134_v0 = vpop.f32.mrb[46].mxu0  ;;  %v3198_v1 = vpop.f32.mrb[46].mxu1  ;;  %v1392_v2 = vmul.f32 0.25, %v885_v61 }
 0x138   :  { %3005 = vst [vmem:[%s3821_s2 + $0x1a0] sm:$0xff] %v2897_v59   ;;  %vm1328_vm14 = vcmp.ge.f32.partialorder %v1141_v62, 0.0  ;;  %vm1267_vm15 = vcmp.ge.f32.partialorder %v3134_v0, 0.0  ;;  %v1395_v3 = vmul.f32 0.25, %v3134_v0  ;;  %v888_v4 = vpop.f32.mrb[47].mxu0  ;;  %v1144_v5 = vpop.f32.mrb[47].mxu1  ;;  %v1522_v6 = vsel %vm1266_vm11, %v3133_v57, %v1394_v60 }
 0x139   :  { %v1456_v7 = vmul.f32 0.25, %v1141_v62  ;;  %vm1331_vm0 = vcmp.ge.f32.partialorder %v3198_v1, 0.0  ;;  %v1459_v8 = vmul.f32 0.25, %v3198_v1  ;;  %v1586_v9 = vsel %vm1330_vm12, %v3197_v58, %v1458_v63 }
 0x13a   :  { %v1523_v10 = vsel %vm1267_vm15, %v3134_v0, %v1395_v3  ;;  %vm1265_vm1 = vcmp.ge.f32.partialorder %v888_v4, 0.0  ;;  %v1393_v11 = vmul.f32 0.25, %v888_v4  ;;  %vm1329_vm2 = vcmp.ge.f32.partialorder %v1144_v5, 0.0 }
 0x13b   :  { %v2752_v12 = vpack.c.bf16 %v1523_v10, %v1522_v6  ;;  %v1587_v13 = vsel %vm1331_vm0, %v3198_v1, %v1459_v8  ;;  %v1457_v14 = vmul.f32 0.25, %v1144_v5  ;;  %v1520_v15 = vsel %vm1264_vm13, %v885_v61, %v1392_v2 }
 0x13c   :  { %v2912_v16 = vpack.c.bf16 %v1587_v13, %v1586_v9  ;;  %v1521_v17 = vsel %vm1265_vm1, %v888_v4, %v1393_v11  ;;  %v1584_v18 = vsel %vm1328_vm14, %v1141_v62, %v1456_v7 }
 0x13d   :  { %2976 = vst [vmem:[%s3821_s2 + $0xb8] sm:$0xff] %v2752_v12   ;;  %v2747_v19 = vpack.c.bf16 %v1521_v17, %v1520_v15  ;;  %v1585_v20 = vsel %vm1329_vm2, %v1144_v5, %v1457_v14  ;;  %v3137_v21 = vpop.f32.mrb[48].mxu0  ;;  %v3201_v22 = vpop.f32.mrb[48].mxu1 }
 0x13e   :  { %3008 = vst [vmem:[%s3821_s2 + $0x1b8] sm:$0xff] %v2912_v16   ;;  %v2907_v23 = vpack.c.bf16 %v1585_v20, %v1584_v18  ;;  %vm1270_vm3 = vcmp.ge.f32.partialorder %v3137_v21, 0.0  ;;  %v1398_v24 = vmul.f32 0.25, %v3137_v21  ;;  %v901_v25 = vpop.f32.mrb[49].mxu0  ;;  %v1157_v26 = vpop.f32.mrb[49].mxu1  ;;  %vm1334_vm4 = vcmp.ge.f32.partialorder %v3201_v22, 0.0 }
 0x13f   :  { %2975 = vst [vmem:[%s3821_s2 + $0xb0] sm:$0xff] %v2747_v19   ;;  %v1462_v27 = vmul.f32 0.25, %v3201_v22  ;;  %vm1268_vm5 = vcmp.ge.f32.partialorder %v901_v25, 0.0  ;;  %v3138_v28 = vpop.f32.mrb[50].mxu0  ;;  %v3202_v29 = vpop.f32.mrb[50].mxu1  ;;  %v1396_v30 = vmul.f32 0.25, %v901_v25 }
 0x140   :  { %3007 = vst [vmem:[%s3821_s2 + $0x1b0] sm:$0xff] %v2907_v23   ;;  %vm1332_vm6 = vcmp.ge.f32.partialorder %v1157_v26, 0.0  ;;  %vm1271_vm7 = vcmp.ge.f32.partialorder %v3138_v28, 0.0  ;;  %v1399_v31 = vmul.f32 0.25, %v3138_v28  ;;  %v904_v32 = vpop.f32.mrb[51].mxu0  ;;  %v1160_v33 = vpop.f32.mrb[51].mxu1  ;;  %v1526_v34 = vsel %vm1270_vm3, %v3137_v21, %v1398_v24 }
 0x141   :  { %v1460_v35 = vmul.f32 0.25, %v1157_v26  ;;  %vm1335_vm8 = vcmp.ge.f32.partialorder %v3202_v29, 0.0  ;;  %v1463_v36 = vmul.f32 0.25, %v3202_v29  ;;  %v1590_v37 = vsel %vm1334_vm4, %v3201_v22, %v1462_v27 }
 0x142   :  { %v1527_v38 = vsel %vm1271_vm7, %v3138_v28, %v1399_v31  ;;  %vm1269_vm9 = vcmp.ge.f32.partialorder %v904_v32, 0.0  ;;  %v1397_v39 = vmul.f32 0.25, %v904_v32  ;;  %vm1333_vm10 = vcmp.ge.f32.partialorder %v1160_v33, 0.0 }
 0x143   :  { %v2762_v40 = vpack.c.bf16 %v1527_v38, %v1526_v34  ;;  %v1591_v41 = vsel %vm1335_vm8, %v3202_v29, %v1463_v36  ;;  %v1461_v42 = vmul.f32 0.25, %v1160_v33  ;;  %v1524_v43 = vsel %vm1268_vm5, %v901_v25, %v1396_v30 }
 0x144   :  { %v2922_v44 = vpack.c.bf16 %v1591_v41, %v1590_v37  ;;  %v1525_v45 = vsel %vm1269_vm9, %v904_v32, %v1397_v39  ;;  %v1588_v46 = vsel %vm1332_vm6, %v1157_v26, %v1460_v35 }
 0x145   :  { %2978 = vst [vmem:[%s3821_s2 + $0xc8] sm:$0xff] %v2762_v40   ;;  %v2757_v47 = vpack.c.bf16 %v1525_v45, %v1524_v43  ;;  %v1589_v48 = vsel %vm1333_vm10, %v1160_v33, %v1461_v42  ;;  %v3141_v49 = vpop.f32.mrb[52].mxu0  ;;  %v3205_v50 = vpop.f32.mrb[52].mxu1 }
 0x146   :  { %3010 = vst [vmem:[%s3821_s2 + $0x1c8] sm:$0xff] %v2922_v44   ;;  %v2917_v51 = vpack.c.bf16 %v1589_v48, %v1588_v46  ;;  %vm1274_vm11 = vcmp.ge.f32.partialorder %v3141_v49, 0.0  ;;  %v1402_v52 = vmul.f32 0.25, %v3141_v49  ;;  %v917_v53 = vpop.f32.mrb[53].mxu0  ;;  %v1173_v54 = vpop.f32.mrb[53].mxu1  ;;  %vm1338_vm12 = vcmp.ge.f32.partialorder %v3205_v50, 0.0 }
 0x147   :  { %2977 = vst [vmem:[%s3821_s2 + $0xc0] sm:$0xff] %v2757_v47   ;;  %v1466_v55 = vmul.f32 0.25, %v3205_v50  ;;  %vm1272_vm13 = vcmp.ge.f32.partialorder %v917_v53, 0.0  ;;  %v3142_v56 = vpop.f32.mrb[54].mxu0  ;;  %v3206_v57 = vpop.f32.mrb[54].mxu1  ;;  %v1400_v58 = vmul.f32 0.25, %v917_v53 }
 0x148   :  { %3009 = vst [vmem:[%s3821_s2 + $0x1c0] sm:$0xff] %v2917_v51   ;;  %vm1336_vm14 = vcmp.ge.f32.partialorder %v1173_v54, 0.0  ;;  %vm1275_vm15 = vcmp.ge.f32.partialorder %v3142_v56, 0.0  ;;  %v1403_v59 = vmul.f32 0.25, %v3142_v56  ;;  %v920_v60 = vpop.f32.mrb[55].mxu0  ;;  %v1176_v61 = vpop.f32.mrb[55].mxu1  ;;  %v1530_v62 = vsel %vm1274_vm11, %v3141_v49, %v1402_v52 }
 0x149   :  { %v1464_v63 = vmul.f32 0.25, %v1173_v54  ;;  %vm1339_vm0 = vcmp.ge.f32.partialorder %v3206_v57, 0.0  ;;  %v1467_v0 = vmul.f32 0.25, %v3206_v57  ;;  %v1594_v1 = vsel %vm1338_vm12, %v3205_v50, %v1466_v55 }
 0x14a   :  { %v1531_v2 = vsel %vm1275_vm15, %v3142_v56, %v1403_v59  ;;  %vm1273_vm1 = vcmp.ge.f32.partialorder %v920_v60, 0.0  ;;  %v1401_v3 = vmul.f32 0.25, %v920_v60  ;;  %vm1337_vm2 = vcmp.ge.f32.partialorder %v1176_v61, 0.0 }
 0x14b   :  { %v2772_v4 = vpack.c.bf16 %v1531_v2, %v1530_v62  ;;  %v1595_v5 = vsel %vm1339_vm0, %v3206_v57, %v1467_v0  ;;  %v1465_v6 = vmul.f32 0.25, %v1176_v61  ;;  %v1528_v7 = vsel %vm1272_vm13, %v917_v53, %v1400_v58 }
 0x14c   :  { %v2932_v8 = vpack.c.bf16 %v1595_v5, %v1594_v1  ;;  %v1529_v9 = vsel %vm1273_vm1, %v920_v60, %v1401_v3  ;;  %v1592_v10 = vsel %vm1336_vm14, %v1173_v54, %v1464_v63 }
 0x14d   :  { %2980 = vst [vmem:[%s3821_s2 + $0xd8] sm:$0xff] %v2772_v4   ;;  %v2767_v11 = vpack.c.bf16 %v1529_v9, %v1528_v7  ;;  %v1593_v12 = vsel %vm1337_vm2, %v1176_v61, %v1465_v6  ;;  %v3145_v13 = vpop.f32.mrb[56].mxu0  ;;  %v3209_v14 = vpop.f32.mrb[56].mxu1 }
 0x14e   :  { %3012 = vst [vmem:[%s3821_s2 + $0x1d8] sm:$0xff] %v2932_v8   ;;  %v2927_v15 = vpack.c.bf16 %v1593_v12, %v1592_v10  ;;  %vm1278_vm3 = vcmp.ge.f32.partialorder %v3145_v13, 0.0  ;;  %v1406_v16 = vmul.f32 0.25, %v3145_v13  ;;  %v933_v17 = vpop.f32.mrb[57].mxu0  ;;  %v1189_v18 = vpop.f32.mrb[57].mxu1  ;;  %vm1342_vm4 = vcmp.ge.f32.partialorder %v3209_v14, 0.0 }
 0x14f   :  { %2979 = vst [vmem:[%s3821_s2 + $0xd0] sm:$0xff] %v2767_v11   ;;  %v1470_v19 = vmul.f32 0.25, %v3209_v14  ;;  %vm1276_vm5 = vcmp.ge.f32.partialorder %v933_v17, 0.0  ;;  %v3146_v20 = vpop.f32.mrb[58].mxu0  ;;  %v3210_v21 = vpop.f32.mrb[58].mxu1  ;;  %v1404_v22 = vmul.f32 0.25, %v933_v17 }
 0x150   :  { %3011 = vst [vmem:[%s3821_s2 + $0x1d0] sm:$0xff] %v2927_v15   ;;  %vm1340_vm6 = vcmp.ge.f32.partialorder %v1189_v18, 0.0  ;;  %vm1279_vm7 = vcmp.ge.f32.partialorder %v3146_v20, 0.0  ;;  %v1407_v23 = vmul.f32 0.25, %v3146_v20  ;;  %v936_v24 = vpop.f32.mrb[59].mxu0  ;;  %v1192_v25 = vpop.f32.mrb[59].mxu1  ;;  %v1534_v26 = vsel %vm1278_vm3, %v3145_v13, %v1406_v16 }
 0x151   :  { %v1468_v27 = vmul.f32 0.25, %v1189_v18  ;;  %vm1343_vm8 = vcmp.ge.f32.partialorder %v3210_v21, 0.0  ;;  %v1471_v28 = vmul.f32 0.25, %v3210_v21  ;;  %v1598_v29 = vsel %vm1342_vm4, %v3209_v14, %v1470_v19 }
 0x152   :  { %v1535_v30 = vsel %vm1279_vm7, %v3146_v20, %v1407_v23  ;;  %vm1277_vm9 = vcmp.ge.f32.partialorder %v936_v24, 0.0  ;;  %v1405_v31 = vmul.f32 0.25, %v936_v24  ;;  %vm1341_vm10 = vcmp.ge.f32.partialorder %v1192_v25, 0.0 }
 0x153   :  { %v2782_v32 = vpack.c.bf16 %v1535_v30, %v1534_v26  ;;  %v1599_v33 = vsel %vm1343_vm8, %v3210_v21, %v1471_v28  ;;  %v1469_v34 = vmul.f32 0.25, %v1192_v25  ;;  %v1532_v35 = vsel %vm1276_vm5, %v933_v17, %v1404_v22 }
 0x154   :  { %v2942_v36 = vpack.c.bf16 %v1599_v33, %v1598_v29  ;;  %v1533_v37 = vsel %vm1277_vm9, %v936_v24, %v1405_v31  ;;  %v1596_v38 = vsel %vm1340_vm6, %v1189_v18, %v1468_v27 }
 0x155   :  { %2982 = vst [vmem:[%s3821_s2 + $0xe8] sm:$0xff] %v2782_v32   ;;  %v2777_v39 = vpack.c.bf16 %v1533_v37, %v1532_v35  ;;  %v1597_v40 = vsel %vm1341_vm10, %v1192_v25, %v1469_v34  ;;  %v3149_v41 = vpop.f32.mrb[60].mxu0  ;;  %v3213_v42 = vpop.f32.mrb[60].mxu1 }
 0x156   :  { %3014 = vst [vmem:[%s3821_s2 + $0x1e8] sm:$0xff] %v2942_v36   ;;  %v2937_v43 = vpack.c.bf16 %v1597_v40, %v1596_v38  ;;  %vm1282_vm11 = vcmp.ge.f32.partialorder %v3149_v41, 0.0  ;;  %v1410_v44 = vmul.f32 0.25, %v3149_v41  ;;  %v949_v45 = vpop.f32.mrb[61].mxu0  ;;  %v1205_v46 = vpop.f32.mrb[61].mxu1  ;;  %vm1346_vm12 = vcmp.ge.f32.partialorder %v3213_v42, 0.0 }
 0x157   :  { %2981 = vst [vmem:[%s3821_s2 + $0xe0] sm:$0xff] %v2777_v39   ;;  %v1474_v47 = vmul.f32 0.25, %v3213_v42  ;;  %vm1280_vm13 = vcmp.ge.f32.partialorder %v949_v45, 0.0  ;;  %v3150_v48 = vpop.f32.mrb[62].mxu0  ;;  %v3214_v49 = vpop.f32.mrb[62].mxu1  ;;  %v1408_v50 = vmul.f32 0.25, %v949_v45 }
 0x158   :  { %3013 = vst [vmem:[%s3821_s2 + $0x1e0] sm:$0xff] %v2937_v43   ;;  %vm1344_vm14 = vcmp.ge.f32.partialorder %v1205_v46, 0.0  ;;  %vm1283_vm15 = vcmp.ge.f32.partialorder %v3150_v48, 0.0  ;;  %v1411_v51 = vmul.f32 0.25, %v3150_v48  ;;  %v952_v52 = vpop.f32.mrb[63].mxu0  ;;  %v1208_v53 = vpop.f32.mrb[63].mxu1  ;;  %v1538_v54 = vsel %vm1282_vm11, %v3149_v41, %v1410_v44 }
 0x159   :  { %v1472_v55 = vmul.f32 0.25, %v1205_v46  ;;  %vm1347_vm0 = vcmp.ge.f32.partialorder %v3214_v49, 0.0  ;;  %v1475_v56 = vmul.f32 0.25, %v3214_v49  ;;  %v1602_v57 = vsel %vm1346_vm12, %v3213_v42, %v1474_v47 }
 0x15a   :  { %v1539_v58 = vsel %vm1283_vm15, %v3150_v48, %v1411_v51  ;;  %vm1281_vm1 = vcmp.ge.f32.partialorder %v952_v52, 0.0  ;;  %v1409_v59 = vmul.f32 0.25, %v952_v52  ;;  %vm1345_vm2 = vcmp.ge.f32.partialorder %v1208_v53, 0.0 }
 0x15b   :  { %v2792_v60 = vpack.c.bf16 %v1539_v58, %v1538_v54  ;;  %v1603_v61 = vsel %vm1347_vm0, %v3214_v49, %v1475_v56  ;;  %v1473_v62 = vmul.f32 0.25, %v1208_v53  ;;  %v1536_v63 = vsel %vm1280_vm13, %v949_v45, %v1408_v50 }
 0x15c   :  { %v2952_v0 = vpack.c.bf16 %v1603_v61, %v1602_v57  ;;  %v1537_v1 = vsel %vm1281_vm1, %v952_v52, %v1409_v59  ;;  %v1600_v2 = vsel %vm1344_vm14, %v1205_v46, %v1472_v55 }
 0x15d   :  { %2984 = vst [vmem:[%s3821_s2 + $0xf8] sm:$0xff] %v2792_v60   ;;  %v2787_v3 = vpack.c.bf16 %v1537_v1, %v1536_v63  ;;  %v1601_v4 = vsel %vm1345_vm2, %v1208_v53, %v1473_v62 }
 0x15e   :  { %3016 = vst [vmem:[%s3821_s2 + $0x1f8] sm:$0xff] %v2952_v0   ;;  %v2947_v5 = vpack.c.bf16 %v1601_v4, %v1600_v2 }
 0x15f   :  { %2983 = vst [vmem:[%s3821_s2 + $0xf0] sm:$0xff] %v2787_v3  }
 0x160   :  { %3015 = vst [vmem:[%s3821_s2 + $0x1f0] sm:$0xff] %v2947_v5  }

</bundles_post_ra>
